<compile_context>
chip_gen: v7x
topology: tpu7x:2x2x1
jax: 0.10.0
libtpu: 0.0.40
codegen_flags: <defaults>
</compile_context>

<pallas_src>
import functools
import math

import jax
import jax.numpy as jnp
from jax.experimental import pallas as pl
from jax.experimental.pallas import tpu as pltpu


# ----------------------------- config -----------------------------

class Config:
    vocab_size = 100
    max_pos = 16
    hidden = 32
    heads = 4
    layers = 2
    ffn = 64


# ----------------------------- in-kernel helpers -----------------------------

def _layernorm(x, g, b, eps=1e-5):
    # x: (M, H) f32, g/b: (1, H) f32
    mu = jnp.mean(x, axis=-1, keepdims=True)
    var = jnp.mean(jnp.square(x - mu), axis=-1, keepdims=True)
    return (x - mu) * jax.lax.rsqrt(var + eps) * g + b


# ----------------------------- embedding kernel -----------------------------
# token gather + position add + embedding LayerNorm, fused.  grid = (B,).

def _embed_kernel(ids_ref, tok_ref, pos_ref, g_ref, b_ref, o_ref, emb):
    b = pl.program_id(0)
    seq = pos_ref.shape[0]
    # Gather S embedding rows from the VMEM-resident table (static unrolled loop,
    # dynamic row index from SMEM-prefetched input_ids).
    for i in range(seq):
        tok_id = ids_ref[b, i]
        emb[pl.ds(i, 1), :] = tok_ref[pl.ds(tok_id, 1), :]
    x = emb[...] + pos_ref[...]
    o_ref[0] = _layernorm(x, g_ref[...], b_ref[...])


def embed(params, input_ids, cfg):
    B, S = input_ids.shape
    H = cfg.hidden
    V = params["tok_emb"].shape[0]
    grid_spec = pltpu.PrefetchScalarGridSpec(
        num_scalar_prefetch=1,           # input_ids -> SMEM
        grid=(B,),
        in_specs=[
            pl.BlockSpec((V, H), lambda b, ids: (0, 0)),   # token table (resident)
            pl.BlockSpec((S, H), lambda b, ids: (0, 0)),   # position rows [0, S)
            pl.BlockSpec((1, H), lambda b, ids: (0, 0)),   # LN gamma
            pl.BlockSpec((1, H), lambda b, ids: (0, 0)),   # LN beta
        ],
        out_specs=pl.BlockSpec((1, S, H), lambda b, ids: (b, 0, 0)),
        scratch_shapes=[pltpu.VMEM((S, H), jnp.float32)],
    )
    return pl.pallas_call(
        _embed_kernel,
        out_shape=jax.ShapeDtypeStruct((B, S, H), jnp.float32),
        grid_spec=grid_spec,
        compiler_params=pltpu.CompilerParams(dimension_semantics=("parallel",)),
    )(input_ids, params["tok_emb"], params["pos_emb"],
      params["emb_ln_g"], params["emb_ln_b"])


# ----------------------------- fused transformer layer kernel -----------------------------
# One grid step = one batch element: QKV proj -> MHA -> out proj -> add&LN -> MLP -> add&LN.

def _transformer_layer_kernel(
        x_ref, bias_ref, wqkv_ref, bqkv_ref, wo_ref, bo_ref,
        ln1_g_ref, ln1_b_ref, w1_ref, b1_ref, w2_ref, b2_ref,
        ln2_g_ref, ln2_b_ref, o_ref, *, num_heads, head_dim):
    x = x_ref[0]                                     # (S, H) f32
    S, H = x.shape
    bias = bias_ref[0]                               # (1, S): 0 = keep, -1e9 = pad

    # Fused Q|K|V projection: single MXU pass, bf16 operands, f32 accumulation.
    qkv = jnp.dot(x.astype(jnp.bfloat16), wqkv_ref[...],
                  preferred_element_type=jnp.float32) + bqkv_ref[...]    # (S, 3H)

    scale = 1.0 / math.sqrt(head_dim)
    attn_acc = jnp.zeros((S, H), jnp.float32)
    for h in range(num_heads):
        q = qkv[:, h * head_dim:(h + 1) * head_dim]                      # (S, D)
        k = qkv[:, H + h * head_dim:H + (h + 1) * head_dim]              # (S, D)
        v = qkv[:, 2 * H + h * head_dim:2 * H + (h + 1) * head_dim]      # (S, D)
        s = jnp.dot(q, k.T, preferred_element_type=jnp.float32) * scale + bias
        m = jnp.max(s, axis=-1, keepdims=True)
        p = jnp.exp(s - m)
        p = p * pl.reciprocal(jnp.sum(p, axis=-1, keepdims=True), approx=True)
        ctx = jnp.dot(p, v, preferred_element_type=jnp.float32)          # (S, D)
        # Accumulate per-head slice of the output projection (no head concat).
        attn_acc = attn_acc + jnp.dot(ctx.astype(jnp.bfloat16), wo_ref[h],
                                      preferred_element_type=jnp.float32)
    attn_out = attn_acc + bo_ref[...]

    x1 = _layernorm(x + attn_out, ln1_g_ref[...], ln1_b_ref[...])

    hmid = jnp.dot(x1.astype(jnp.bfloat16), w1_ref[...],
                   preferred_element_type=jnp.float32) + b1_ref[...]
    hmid = jax.nn.gelu(hmid)
    ff = jnp.dot(hmid.astype(jnp.bfloat16), w2_ref[...],
                 preferred_element_type=jnp.float32) + b2_ref[...]

    o_ref[0] = _layernorm(x1 + ff, ln2_g_ref[...], ln2_b_ref[...])


def transformer_layer(x, attn_bias, lp, cfg):
    B, S, H = x.shape
    F = lp["w1"].shape[1]
    nH = cfg.heads
    D = H // nH
    kernel = functools.partial(_transformer_layer_kernel, num_heads=nH, head_dim=D)

    def full(shape):
        # Whole-array block, constant block index -> DMA'd once across the grid.
        return pl.BlockSpec(shape, lambda b, _s=shape: (0,) * len(_s))

    in_specs = [
        pl.BlockSpec((1, S, H), lambda b: (b, 0, 0)),   # x
        pl.BlockSpec((1, 1, S), lambda b: (b, 0, 0)),   # additive key mask
        full((H, 3 * H)), full((1, 3 * H)),             # wqkv (bf16), bqkv
        full((nH, D, H)), full((1, H)),                 # wo (bf16, per-head), bo
        full((1, H)), full((1, H)),                     # ln1 gamma/beta
        full((H, F)), full((1, F)),                     # w1 (bf16), b1
        full((F, H)), full((1, H)),                     # w2 (bf16), b2
        full((1, H)), full((1, H)),                     # ln2 gamma/beta
    ]
    return pl.pallas_call(
        kernel,
        out_shape=jax.ShapeDtypeStruct((B, S, H), jnp.float32),
        grid=(B,),
        in_specs=in_specs,
        out_specs=pl.BlockSpec((1, S, H), lambda b: (b, 0, 0)),
        compiler_params=pltpu.CompilerParams(dimension_semantics=("parallel",)),
    )(x, attn_bias, lp["wqkv"], lp["bqkv"], lp["wo"], lp["bo"],
      lp["ln1_g"], lp["ln1_b"], lp["w1"], lp["b1"], lp["w2"], lp["b2"],
      lp["ln2_g"], lp["ln2_b"])


# ----------------------------- model -----------------------------

def init_params(key, cfg):
    def nrm(k, shape, scale=0.02):
        return scale * jax.random.normal(k, shape, dtype=jnp.float32)

    H, F, nH = cfg.hidden, cfg.ffn, cfg.heads
    D = H // nH
    keys = jax.random.split(key, 2 + cfg.layers)
    params = {
        "tok_emb": nrm(keys[0], (cfg.vocab_size, H)),
        "pos_emb": nrm(keys[1], (cfg.max_pos, H)),
        "emb_ln_g": jnp.ones((1, H), jnp.float32),
        "emb_ln_b": jnp.zeros((1, H), jnp.float32),
        "layers": [],
    }
    for li in range(cfg.layers):
        lk = jax.random.split(keys[2 + li], 6)
        wq, wk, wv = nrm(lk[0], (H, H)), nrm(lk[1], (H, H)), nrm(lk[2], (H, H))
        wo = nrm(lk[3], (H, H))
        params["layers"].append({
            # Matmul weights stored in bf16 (MXU-native on v6e/v7x, halves DMA bytes).
            "wqkv": jnp.concatenate([wq, wk, wv], axis=1).astype(jnp.bfloat16),
            "bqkv": jnp.zeros((1, 3 * H), jnp.float32),
            "wo": wo.reshape(nH, D, H).astype(jnp.bfloat16),   # per-head row blocks
            "bo": jnp.zeros((1, H), jnp.float32),
            "ln1_g": jnp.ones((1, H), jnp.float32),
            "ln1_b": jnp.zeros((1, H), jnp.float32),
            "w1": nrm(lk[4], (H, F)).astype(jnp.bfloat16),
            "b1": jnp.zeros((1, F), jnp.float32),
            "w2": nrm(lk[5], (F, H)).astype(jnp.bfloat16),
            "b2": jnp.zeros((1, H), jnp.float32),
            "ln2_g": jnp.ones((1, H), jnp.float32),
            "ln2_b": jnp.zeros((1, H), jnp.float32),
        })
    return params


def text_embedding_forward(params, input_ids, attention_mask, cfg):
    """BERT-style encoder forward; returns last_hidden_state (B, S, hidden) f32."""
    B, S = input_ids.shape
    x = embed(params, input_ids, cfg)                                  # (B, S, H)
    attn_bias = ((1.0 - attention_mask.astype(jnp.float32)) * (-1e9)).reshape(B, 1, S)
    for lp in params["layers"]:
        x = transformer_layer(x, attn_bias, lp, cfg)
    return x   # last_hidden_state


# ----------------------------- main -----------------------------

if __name__ == "__main__":
    cfg = Config()
    key = jax.random.PRNGKey(0)
    k_param, k_ids = jax.random.split(key)

    params = init_params(k_param, cfg)

    B, S = 2, 8
    input_ids = jax.random.randint(k_ids, (B, S), 0, cfg.vocab_size, dtype=jnp.int32)
    # batch 0: full length, batch 1: 5 valid tokens then padding
    attention_mask = jnp.array(
        [[1, 1, 1, 1, 1, 1, 1, 1],
         [1, 1, 1, 1, 1, 0, 0, 0]], dtype=jnp.int32)

    fwd = jax.jit(functools.partial(text_embedding_forward, cfg=cfg))
    last_hidden_state = fwd(params, input_ids, attention_mask)
    last_hidden_state = jax.block_until_ready(last_hidden_state)

    assert last_hidden_state.shape == (B, S, cfg.hidden)
    assert last_hidden_state.dtype == jnp.float32
    print("KERNEL_OK")
</pallas_src>

<mosaic_0001>
module attributes {stable_mosaic.version = 11 : i64} {
  func.func @_embed_kernel(%arg0: i32, %arg1: memref<2x8xi32, #tpu.memory_space<smem>>, %arg2: memref<100x32xf32, #tpu.memory_space<vmem>>, %arg3: memref<8x32xf32, #tpu.memory_space<vmem>>, %arg4: memref<1x32xf32, #tpu.memory_space<vmem>>, %arg5: memref<1x32xf32, #tpu.memory_space<vmem>>, %arg6: memref<1x8x32xf32, #tpu.memory_space<vmem>>, %arg7: memref<8x32xf32, #tpu.memory_space<vmem>>) attributes {dimension_semantics = [#tpu.dimension_semantics<parallel>], iteration_bounds = array<i64: 2>, scalar_prefetch = 1 : i64, scratch_operands = 1 : i64, tpu.core_type = #tpu.core_type<tc>, window_params = [{pipeline_mode = #tpu.pipeline_mode<synchronous>, transform_indices = @transform_0, window_bounds = array<i64: 100, 32>}, {transform_indices = @transform_1, window_bounds = array<i64: 8, 32>}, {pipeline_mode = #tpu.pipeline_mode<synchronous>, transform_indices = @transform_2, window_bounds = array<i64: 1, 32>}, {pipeline_mode = #tpu.pipeline_mode<synchronous>, transform_indices = @transform_3, window_bounds = array<i64: 1, 32>}, {transform_indices = @transform_4, window_bounds = array<i64: 1, 8, 32>}]} {
    %0 = arith.index_cast %arg0 : i32 to index
    %c0 = arith.constant 0 : index
    %1 = memref.load %arg1[%0, %c0] : memref<2x8xi32, #tpu.memory_space<smem>>
    %2 = arith.index_cast %1 : i32 to index
    %c0_0 = arith.constant 0 : index
    %3 = vector.load %arg2[%2, %c0_0] : memref<100x32xf32, #tpu.memory_space<vmem>>, vector<1x32xf32>
    %c0_1 = arith.constant 0 : index
    %c0_2 = arith.constant 0 : index
    %4 = vector.load %arg7[%c0_1, %c0_2] : memref<8x32xf32, #tpu.memory_space<vmem>>, vector<1x32xf32>
    tpu.vector_store %arg7[%c0_1, %c0_2], %3 {strides = array<i32>} : memref<8x32xf32, #tpu.memory_space<vmem>>, vector<1x32xf32>,
    %5 = arith.index_cast %arg0 : i32 to index
    %c1 = arith.constant 1 : index
    %6 = memref.load %arg1[%5, %c1] : memref<2x8xi32, #tpu.memory_space<smem>>
    %7 = arith.index_cast %6 : i32 to index
    %c0_3 = arith.constant 0 : index
    %8 = vector.load %arg2[%7, %c0_3] : memref<100x32xf32, #tpu.memory_space<vmem>>, vector<1x32xf32>
    %c1_4 = arith.constant 1 : index
    %c0_5 = arith.constant 0 : index
    %9 = vector.load %arg7[%c1_4, %c0_5] : memref<8x32xf32, #tpu.memory_space<vmem>>, vector<1x32xf32>
    tpu.vector_store %arg7[%c1_4, %c0_5], %8 {strides = array<i32>} : memref<8x32xf32, #tpu.memory_space<vmem>>, vector<1x32xf32>,
    %10 = arith.index_cast %arg0 : i32 to index
    %c2 = arith.constant 2 : index
    %11 = memref.load %arg1[%10, %c2] : memref<2x8xi32, #tpu.memory_space<smem>>
    %12 = arith.index_cast %11 : i32 to index
    %c0_6 = arith.constant 0 : index
    %13 = vector.load %arg2[%12, %c0_6] : memref<100x32xf32, #tpu.memory_space<vmem>>, vector<1x32xf32>
    %c2_7 = arith.constant 2 : index
    %c0_8 = arith.constant 0 : index
    %14 = vector.load %arg7[%c2_7, %c0_8] : memref<8x32xf32, #tpu.memory_space<vmem>>, vector<1x32xf32>
    tpu.vector_store %arg7[%c2_7, %c0_8], %13 {strides = array<i32>} : memref<8x32xf32, #tpu.memory_space<vmem>>, vector<1x32xf32>,
    %15 = arith.index_cast %arg0 : i32 to index
    %c3 = arith.constant 3 : index
    %16 = memref.load %arg1[%15, %c3] : memref<2x8xi32, #tpu.memory_space<smem>>
    %17 = arith.index_cast %16 : i32 to index
    %c0_9 = arith.constant 0 : index
    %18 = vector.load %arg2[%17, %c0_9] : memref<100x32xf32, #tpu.memory_space<vmem>>, vector<1x32xf32>
    %c3_10 = arith.constant 3 : index
    %c0_11 = arith.constant 0 : index
    %19 = vector.load %arg7[%c3_10, %c0_11] : memref<8x32xf32, #tpu.memory_space<vmem>>, vector<1x32xf32>
    tpu.vector_store %arg7[%c3_10, %c0_11], %18 {strides = array<i32>} : memref<8x32xf32, #tpu.memory_space<vmem>>, vector<1x32xf32>,
    %20 = arith.index_cast %arg0 : i32 to index
    %c4 = arith.constant 4 : index
    %21 = memref.load %arg1[%20, %c4] : memref<2x8xi32, #tpu.memory_space<smem>>
    %22 = arith.index_cast %21 : i32 to index
    %c0_12 = arith.constant 0 : index
    %23 = vector.load %arg2[%22, %c0_12] : memref<100x32xf32, #tpu.memory_space<vmem>>, vector<1x32xf32>
    %c4_13 = arith.constant 4 : index
    %c0_14 = arith.constant 0 : index
    %24 = vector.load %arg7[%c4_13, %c0_14] : memref<8x32xf32, #tpu.memory_space<vmem>>, vector<1x32xf32>
    tpu.vector_store %arg7[%c4_13, %c0_14], %23 {strides = array<i32>} : memref<8x32xf32, #tpu.memory_space<vmem>>, vector<1x32xf32>,
    %25 = arith.index_cast %arg0 : i32 to index
    %c5 = arith.constant 5 : index
    %26 = memref.load %arg1[%25, %c5] : memref<2x8xi32, #tpu.memory_space<smem>>
    %27 = arith.index_cast %26 : i32 to index
    %c0_15 = arith.constant 0 : index
    %28 = vector.load %arg2[%27, %c0_15] : memref<100x32xf32, #tpu.memory_space<vmem>>, vector<1x32xf32>
    %c5_16 = arith.constant 5 : index
    %c0_17 = arith.constant 0 : index
    %29 = vector.load %arg7[%c5_16, %c0_17] : memref<8x32xf32, #tpu.memory_space<vmem>>, vector<1x32xf32>
    tpu.vector_store %arg7[%c5_16, %c0_17], %28 {strides = array<i32>} : memref<8x32xf32, #tpu.memory_space<vmem>>, vector<1x32xf32>,
    %30 = arith.index_cast %arg0 : i32 to index
    %c6 = arith.constant 6 : index
    %31 = memref.load %arg1[%30, %c6] : memref<2x8xi32, #tpu.memory_space<smem>>
    %32 = arith.index_cast %31 : i32 to index
    %c0_18 = arith.constant 0 : index
    %33 = vector.load %arg2[%32, %c0_18] : memref<100x32xf32, #tpu.memory_space<vmem>>, vector<1x32xf32>
    %c6_19 = arith.constant 6 : index
    %c0_20 = arith.constant 0 : index
    %34 = vector.load %arg7[%c6_19, %c0_20] : memref<8x32xf32, #tpu.memory_space<vmem>>, vector<1x32xf32>
    tpu.vector_store %arg7[%c6_19, %c0_20], %33 {strides = array<i32>} : memref<8x32xf32, #tpu.memory_space<vmem>>, vector<1x32xf32>,
    %35 = arith.index_cast %arg0 : i32 to index
    %c7 = arith.constant 7 : index
    %36 = memref.load %arg1[%35, %c7] : memref<2x8xi32, #tpu.memory_space<smem>>
    %37 = arith.index_cast %36 : i32 to index
    %c0_21 = arith.constant 0 : index
    %38 = vector.load %arg2[%37, %c0_21] : memref<100x32xf32, #tpu.memory_space<vmem>>, vector<1x32xf32>
    %c7_22 = arith.constant 7 : index
    %c0_23 = arith.constant 0 : index
    %39 = vector.load %arg7[%c7_22, %c0_23] : memref<8x32xf32, #tpu.memory_space<vmem>>, vector<1x32xf32>
    tpu.vector_store %arg7[%c7_22, %c0_23], %38 {strides = array<i32>} : memref<8x32xf32, #tpu.memory_space<vmem>>, vector<1x32xf32>,
    %c0_24 = arith.constant 0 : index
    %c0_25 = arith.constant 0 : index
    %40 = vector.load %arg7[%c0_24, %c0_25] : memref<8x32xf32, #tpu.memory_space<vmem>>, vector<8x32xf32>
    %c0_26 = arith.constant 0 : index
    %c0_27 = arith.constant 0 : index
    %41 = vector.load %arg3[%c0_26, %c0_27] : memref<8x32xf32, #tpu.memory_space<vmem>>, vector<8x32xf32>
    %42 = arith.addf %40, %41 : vector<8x32xf32>
    %c0_28 = arith.constant 0 : index
    %c0_29 = arith.constant 0 : index
    %43 = vector.load %arg4[%c0_28, %c0_29] : memref<1x32xf32, #tpu.memory_space<vmem>>, vector<1x32xf32>
    %c0_30 = arith.constant 0 : index
    %c0_31 = arith.constant 0 : index
    %44 = vector.load %arg5[%c0_30, %c0_31] : memref<1x32xf32, #tpu.memory_space<vmem>>, vector<1x32xf32>
    %cst = arith.constant dense<0.000000e+00> : vector<8xf32>
    %45 = vector.multi_reduction <add>, %42, %cst [1] : vector<8x32xf32> to vector<8xf32>
    %46 = vector.shape_cast %45 : vector<8xf32> to vector<8x1xf32>
    %cst_32 = arith.constant 3.200000e+01 : f32
    %47 = vector.broadcast %cst_32 : f32 to vector<8x1xf32>
    %48 = arith.divf %46, %47 : vector<8x1xf32>
    %49 = vector.broadcast %48 : vector<8x1xf32> to vector<8x32xf32>
    %50 = arith.subf %42, %49 : vector<8x32xf32>
    %51 = arith.mulf %50, %50 : vector<8x32xf32>
    %cst_33 = arith.constant dense<0.000000e+00> : vector<8xf32>
    %52 = vector.multi_reduction <add>, %51, %cst_33 [1] : vector<8x32xf32> to vector<8xf32>
    %53 = vector.shape_cast %52 : vector<8xf32> to vector<8x1xf32>
    %cst_34 = arith.constant 3.200000e+01 : f32
    %54 = vector.broadcast %cst_34 : f32 to vector<8x1xf32>
    %55 = arith.divf %53, %54 : vector<8x1xf32>
    %56 = vector.broadcast %48 : vector<8x1xf32> to vector<8x32xf32>
    %57 = arith.subf %42, %56 : vector<8x32xf32>
    %cst_35 = arith.constant 9.99999974E-6 : f32
    %58 = vector.broadcast %cst_35 : f32 to vector<8x1xf32>
    %59 = arith.addf %55, %58 : vector<8x1xf32>
    %60 = math.rsqrt %59 : vector<8x1xf32>
    %61 = vector.broadcast %60 : vector<8x1xf32> to vector<8x32xf32>
    %62 = arith.mulf %57, %61 : vector<8x32xf32>
    %63 = vector.broadcast %43 : vector<1x32xf32> to vector<8x32xf32>
    %64 = arith.mulf %62, %63 : vector<8x32xf32>
    %65 = vector.broadcast %44 : vector<1x32xf32> to vector<8x32xf32>
    %66 = arith.addf %64, %65 : vector<8x32xf32>
    %c0_36 = arith.constant 0 : index
    %c0_37 = arith.constant 0 : index
    %c0_38 = arith.constant 0 : index
    %67 = vector.load %arg6[%c0_36, %c0_37, %c0_38] : memref<1x8x32xf32, #tpu.memory_space<vmem>>, vector<1x8x32xf32>
    %68 = vector.shape_cast %67 : vector<1x8x32xf32> to vector<8x32xf32>
    %69 = vector.shape_cast %66 : vector<8x32xf32> to vector<1x8x32xf32>
    tpu.vector_store %arg6[%c0_36, %c0_37, %c0_38], %69 {strides = array<i32>} : memref<1x8x32xf32, #tpu.memory_space<vmem>>, vector<1x8x32xf32>,
    return
  }
  func.func @transform_0(%arg0: i32, %arg1: memref<2x8xi32, #tpu.memory_space<smem>>) -> (i32, i32) {
    %c0_i32 = arith.constant 0 : i32
    %c0_i32_0 = arith.constant 0 : i32
    %c0_i32_1 = arith.constant 0 : i32
    return %c0_i32, %c0_i32_0 : i32, i32
  }
  func.func @transform_1(%arg0: i32, %arg1: memref<2x8xi32, #tpu.memory_space<smem>>) -> (i32, i32) {
    %c0_i32 = arith.constant 0 : i32
    %c0_i32_0 = arith.constant 0 : i32
    %c0_i32_1 = arith.constant 0 : i32
    return %c0_i32, %c0_i32_0 : i32, i32
  }
  func.func @transform_2(%arg0: i32, %arg1: memref<2x8xi32, #tpu.memory_space<smem>>) -> (i32, i32) {
    %c0_i32 = arith.constant 0 : i32
    %c0_i32_0 = arith.constant 0 : i32
    %c0_i32_1 = arith.constant 0 : i32
    return %c0_i32, %c0_i32_0 : i32, i32
  }
  func.func @transform_3(%arg0: i32, %arg1: memref<2x8xi32, #tpu.memory_space<smem>>) -> (i32, i32) {
    %c0_i32 = arith.constant 0 : i32
    %c0_i32_0 = arith.constant 0 : i32
    %c0_i32_1 = arith.constant 0 : i32
    return %c0_i32, %c0_i32_0 : i32, i32
  }
  func.func @transform_4(%arg0: i32, %arg1: memref<2x8xi32, #tpu.memory_space<smem>>) -> (i32, i32, i32) {
    %c0_i32 = arith.constant 0 : i32
    %c0_i32_0 = arith.constant 0 : i32
    %c0_i32_1 = arith.constant 0 : i32
    return %arg0, %c0_i32, %c0_i32_0 : i32, i32, i32
  }
}

module attributes {stable_mosaic.version = 11 : i64} {
  func.func @_transformer_layer_kernel(%arg0: i32, %arg1: memref<1x8x32xf32, #tpu.memory_space<vmem>>, %arg2: memref<1x1x8xf32, #tpu.memory_space<vmem>>, %arg3: memref<32x96xbf16, #tpu.memory_space<vmem>>, %arg4: memref<1x96xf32, #tpu.memory_space<vmem>>, %arg5: memref<4x8x32xbf16, #tpu.memory_space<vmem>>, %arg6: memref<1x32xf32, #tpu.memory_space<vmem>>, %arg7: memref<1x32xf32, #tpu.memory_space<vmem>>, %arg8: memref<1x32xf32, #tpu.memory_space<vmem>>, %arg9: memref<32x64xbf16, #tpu.memory_space<vmem>>, %arg10: memref<1x64xf32, #tpu.memory_space<vmem>>, %arg11: memref<64x32xbf16, #tpu.memory_space<vmem>>, %arg12: memref<1x32xf32, #tpu.memory_space<vmem>>, %arg13: memref<1x32xf32, #tpu.memory_space<vmem>>, %arg14: memref<1x32xf32, #tpu.memory_space<vmem>>, %arg15: memref<1x8x32xf32, #tpu.memory_space<vmem>>) attributes {dimension_semantics = [#tpu.dimension_semantics<parallel>], iteration_bounds = array<i64: 2>, scalar_prefetch = 0 : i64, scratch_operands = 0 : i64, tpu.core_type = #tpu.core_type<tc>, window_params = [{transform_indices = @transform_0, window_bounds = array<i64: 1, 8, 32>}, {transform_indices = @transform_1, window_bounds = array<i64: 1, 1, 8>}, {pipeline_mode = #tpu.pipeline_mode<synchronous>, transform_indices = @transform_2, window_bounds = array<i64: 32, 96>}, {pipeline_mode = #tpu.pipeline_mode<synchronous>, transform_indices = @transform_3, window_bounds = array<i64: 1, 96>}, {pipeline_mode = #tpu.pipeline_mode<synchronous>, transform_indices = @transform_4, window_bounds = array<i64: 4, 8, 32>}, {pipeline_mode = #tpu.pipeline_mode<synchronous>, transform_indices = @transform_5, window_bounds = array<i64: 1, 32>}, {pipeline_mode = #tpu.pipeline_mode<synchronous>, transform_indices = @transform_6, window_bounds = array<i64: 1, 32>}, {pipeline_mode = #tpu.pipeline_mode<synchronous>, transform_indices = @transform_7, window_bounds = array<i64: 1, 32>}, {pipeline_mode = #tpu.pipeline_mode<synchronous>, transform_indices = @transform_8, window_bounds = array<i64: 32, 64>}, {pipeline_mode = #tpu.pipeline_mode<synchronous>, transform_indices = @transform_9, window_bounds = array<i64: 1, 64>}, {pipeline_mode = #tpu.pipeline_mode<synchronous>, transform_indices = @transform_10, window_bounds = array<i64: 64, 32>}, {pipeline_mode = #tpu.pipeline_mode<synchronous>, transform_indices = @transform_11, window_bounds = array<i64: 1, 32>}, {pipeline_mode = #tpu.pipeline_mode<synchronous>, transform_indices = @transform_12, window_bounds = array<i64: 1, 32>}, {pipeline_mode = #tpu.pipeline_mode<synchronous>, transform_indices = @transform_13, window_bounds = array<i64: 1, 32>}, {transform_indices = @transform_14, window_bounds = array<i64: 1, 8, 32>}]} {
    %c0 = arith.constant 0 : index
    %c0_0 = arith.constant 0 : index
    %c0_1 = arith.constant 0 : index
    %0 = vector.load %arg1[%c0, %c0_0, %c0_1] : memref<1x8x32xf32, #tpu.memory_space<vmem>>, vector<1x8x32xf32>
    %1 = vector.shape_cast %0 : vector<1x8x32xf32> to vector<8x32xf32>
    %c0_2 = arith.constant 0 : index
    %c0_3 = arith.constant 0 : index
    %c0_4 = arith.constant 0 : index
    %2 = vector.load %arg2[%c0_2, %c0_3, %c0_4] : memref<1x1x8xf32, #tpu.memory_space<vmem>>, vector<1x1x8xf32>
    %3 = vector.shape_cast %2 : vector<1x1x8xf32> to vector<1x8xf32>
    %4 = arith.truncf %1 : vector<8x32xf32> to vector<8x32xbf16>
    %c0_5 = arith.constant 0 : index
    %c0_6 = arith.constant 0 : index
    %5 = vector.load %arg3[%c0_5, %c0_6] : memref<32x96xbf16, #tpu.memory_space<vmem>>, vector<32x96xbf16>
    %cst = arith.constant dense<0.000000e+00> : vector<8x96xf32>
    %6 = tpu.matmul %4, %5, %cst {dimension_numbers = #tpu.dot_dimension_numbers<[1], [0], [0], [1], [0, 0, 1, 1], [], []>} : vector<8x32xbf16>, vector<32x96xbf16>, vector<8x96xf32> -> vector<8x96xf32>
    %c0_7 = arith.constant 0 : index
    %c0_8 = arith.constant 0 : index
    %7 = vector.load %arg4[%c0_7, %c0_8] : memref<1x96xf32, #tpu.memory_space<vmem>>, vector<1x96xf32>
    %8 = vector.broadcast %7 : vector<1x96xf32> to vector<8x96xf32>
    %9 = arith.addf %6, %8 : vector<8x96xf32>
    %cst_9 = arith.constant 0.000000e+00 : f32
    %10 = vector.broadcast %cst_9 : f32 to vector<8x32xf32>
    %11 = vector.extract_strided_slice %9 {offsets = [0, 0], sizes = [8, 8], strides = [1, 1]} : vector<8x96xf32> to vector<8x8xf32>
    %12 = vector.extract_strided_slice %9 {offsets = [0, 32], sizes = [8, 8], strides = [1, 1]} : vector<8x96xf32> to vector<8x8xf32>
    %13 = vector.extract_strided_slice %9 {offsets = [0, 64], sizes = [8, 8], strides = [1, 1]} : vector<8x96xf32> to vector<8x8xf32>
    %14 = tpu.transpose %12, [1, 0] : vector<8x8xf32> -> vector<8x8xf32>
    %cst_10 = arith.constant dense<0.000000e+00> : vector<8x8xf32>
    %15 = tpu.matmul %11, %14, %cst_10 {dimension_numbers = #tpu.dot_dimension_numbers<[1], [0], [0], [1], [0, 0, 1, 1], [], []>} : vector<8x8xf32>, vector<8x8xf32>, vector<8x8xf32> -> vector<8x8xf32>
    %cst_11 = arith.constant 0.353553385 : f32
    %16 = vector.broadcast %cst_11 : f32 to vector<8x8xf32>
    %17 = arith.mulf %15, %16 : vector<8x8xf32>
    %18 = vector.broadcast %3 : vector<1x8xf32> to vector<8x8xf32>
    %19 = arith.addf %17, %18 : vector<8x8xf32>
    %cst_12 = arith.constant dense<0xFF800000> : vector<8xf32>
    %20 = vector.multi_reduction <maximumf>, %19, %cst_12 [1] : vector<8x8xf32> to vector<8xf32>
    %21 = vector.shape_cast %20 : vector<8xf32> to vector<8x1xf32>
    %22 = vector.broadcast %21 : vector<8x1xf32> to vector<8x8xf32>
    %23 = arith.subf %19, %22 : vector<8x8xf32>
    %24 = math.exp %23 : vector<8x8xf32>
    %cst_13 = arith.constant dense<0.000000e+00> : vector<8xf32>
    %25 = vector.multi_reduction <add>, %24, %cst_13 [1] : vector<8x8xf32> to vector<8xf32>
    %26 = vector.shape_cast %25 : vector<8xf32> to vector<8x1xf32>
    %27 = tpu.reciprocal %26 {approx = true} : vector<8x1xf32> -> vector<8x1xf32>
    %28 = vector.broadcast %27 : vector<8x1xf32> to vector<8x8xf32>
    %29 = arith.mulf %24, %28 : vector<8x8xf32>
    %cst_14 = arith.constant dense<0.000000e+00> : vector<8x8xf32>
    %30 = tpu.matmul %29, %13, %cst_14 {dimension_numbers = #tpu.dot_dimension_numbers<[1], [0], [0], [1], [0, 0, 1, 1], [], []>} : vector<8x8xf32>, vector<8x8xf32>, vector<8x8xf32> -> vector<8x8xf32>
    %31 = arith.truncf %30 : vector<8x8xf32> to vector<8x8xbf16>
    %c0_15 = arith.constant 0 : index
    %c0_16 = arith.constant 0 : index
    %c0_17 = arith.constant 0 : index
    %32 = vector.load %arg5[%c0_15, %c0_16, %c0_17] : memref<4x8x32xbf16, #tpu.memory_space<vmem>>, vector<1x8x32xbf16>
    %33 = vector.shape_cast %32 : vector<1x8x32xbf16> to vector<8x32xbf16>
    %cst_18 = arith.constant dense<0.000000e+00> : vector<8x32xf32>
    %34 = tpu.matmul %31, %33, %cst_18 {dimension_numbers = #tpu.dot_dimension_numbers<[1], [0], [0], [1], [0, 0, 1, 1], [], []>} : vector<8x8xbf16>, vector<8x32xbf16>, vector<8x32xf32> -> vector<8x32xf32>
    %35 = arith.addf %10, %34 : vector<8x32xf32>
    %36 = vector.extract_strided_slice %9 {offsets = [0, 8], sizes = [8, 8], strides = [1, 1]} : vector<8x96xf32> to vector<8x8xf32>
    %37 = vector.extract_strided_slice %9 {offsets = [0, 40], sizes = [8, 8], strides = [1, 1]} : vector<8x96xf32> to vector<8x8xf32>
    %38 = vector.extract_strided_slice %9 {offsets = [0, 72], sizes = [8, 8], strides = [1, 1]} : vector<8x96xf32> to vector<8x8xf32>
    %39 = tpu.transpose %37, [1, 0] : vector<8x8xf32> -> vector<8x8xf32>
    %cst_19 = arith.constant dense<0.000000e+00> : vector<8x8xf32>
    %40 = tpu.matmul %36, %39, %cst_19 {dimension_numbers = #tpu.dot_dimension_numbers<[1], [0], [0], [1], [0, 0, 1, 1], [], []>} : vector<8x8xf32>, vector<8x8xf32>, vector<8x8xf32> -> vector<8x8xf32>
    %cst_20 = arith.constant 0.353553385 : f32
    %41 = vector.broadcast %cst_20 : f32 to vector<8x8xf32>
    %42 = arith.mulf %40, %41 : vector<8x8xf32>
    %43 = vector.broadcast %3 : vector<1x8xf32> to vector<8x8xf32>
    %44 = arith.addf %42, %43 : vector<8x8xf32>
    %cst_21 = arith.constant dense<0xFF800000> : vector<8xf32>
    %45 = vector.multi_reduction <maximumf>, %44, %cst_21 [1] : vector<8x8xf32> to vector<8xf32>
    %46 = vector.shape_cast %45 : vector<8xf32> to vector<8x1xf32>
    %47 = vector.broadcast %46 : vector<8x1xf32> to vector<8x8xf32>
    %48 = arith.subf %44, %47 : vector<8x8xf32>
    %49 = math.exp %48 : vector<8x8xf32>
    %cst_22 = arith.constant dense<0.000000e+00> : vector<8xf32>
    %50 = vector.multi_reduction <add>, %49, %cst_22 [1] : vector<8x8xf32> to vector<8xf32>
    %51 = vector.shape_cast %50 : vector<8xf32> to vector<8x1xf32>
    %52 = tpu.reciprocal %51 {approx = true} : vector<8x1xf32> -> vector<8x1xf32>
    %53 = vector.broadcast %52 : vector<8x1xf32> to vector<8x8xf32>
    %54 = arith.mulf %49, %53 : vector<8x8xf32>
    %cst_23 = arith.constant dense<0.000000e+00> : vector<8x8xf32>
    %55 = tpu.matmul %54, %38, %cst_23 {dimension_numbers = #tpu.dot_dimension_numbers<[1], [0], [0], [1], [0, 0, 1, 1], [], []>} : vector<8x8xf32>, vector<8x8xf32>, vector<8x8xf32> -> vector<8x8xf32>
    %56 = arith.truncf %55 : vector<8x8xf32> to vector<8x8xbf16>
    %c1 = arith.constant 1 : index
    %c0_24 = arith.constant 0 : index
    %c0_25 = arith.constant 0 : index
    %57 = vector.load %arg5[%c1, %c0_24, %c0_25] : memref<4x8x32xbf16, #tpu.memory_space<vmem>>, vector<1x8x32xbf16>
    %58 = vector.shape_cast %57 : vector<1x8x32xbf16> to vector<8x32xbf16>
    %cst_26 = arith.constant dense<0.000000e+00> : vector<8x32xf32>
    %59 = tpu.matmul %56, %58, %cst_26 {dimension_numbers = #tpu.dot_dimension_numbers<[1], [0], [0], [1], [0, 0, 1, 1], [], []>} : vector<8x8xbf16>, vector<8x32xbf16>, vector<8x32xf32> -> vector<8x32xf32>
    %60 = arith.addf %35, %59 : vector<8x32xf32>
    %61 = vector.extract_strided_slice %9 {offsets = [0, 16], sizes = [8, 8], strides = [1, 1]} : vector<8x96xf32> to vector<8x8xf32>
    %62 = vector.extract_strided_slice %9 {offsets = [0, 48], sizes = [8, 8], strides = [1, 1]} : vector<8x96xf32> to vector<8x8xf32>
    %63 = vector.extract_strided_slice %9 {offsets = [0, 80], sizes = [8, 8], strides = [1, 1]} : vector<8x96xf32> to vector<8x8xf32>
    %64 = tpu.transpose %62, [1, 0] : vector<8x8xf32> -> vector<8x8xf32>
    %cst_27 = arith.constant dense<0.000000e+00> : vector<8x8xf32>
    %65 = tpu.matmul %61, %64, %cst_27 {dimension_numbers = #tpu.dot_dimension_numbers<[1], [0], [0], [1], [0, 0, 1, 1], [], []>} : vector<8x8xf32>, vector<8x8xf32>, vector<8x8xf32> -> vector<8x8xf32>
    %cst_28 = arith.constant 0.353553385 : f32
    %66 = vector.broadcast %cst_28 : f32 to vector<8x8xf32>
    %67 = arith.mulf %65, %66 : vector<8x8xf32>
    %68 = vector.broadcast %3 : vector<1x8xf32> to vector<8x8xf32>
    %69 = arith.addf %67, %68 : vector<8x8xf32>
    %cst_29 = arith.constant dense<0xFF800000> : vector<8xf32>
    %70 = vector.multi_reduction <maximumf>, %69, %cst_29 [1] : vector<8x8xf32> to vector<8xf32>
    %71 = vector.shape_cast %70 : vector<8xf32> to vector<8x1xf32>
    %72 = vector.broadcast %71 : vector<8x1xf32> to vector<8x8xf32>
    %73 = arith.subf %69, %72 : vector<8x8xf32>
    %74 = math.exp %73 : vector<8x8xf32>
    %cst_30 = arith.constant dense<0.000000e+00> : vector<8xf32>
    %75 = vector.multi_reduction <add>, %74, %cst_30 [1] : vector<8x8xf32> to vector<8xf32>
    %76 = vector.shape_cast %75 : vector<8xf32> to vector<8x1xf32>
    %77 = tpu.reciprocal %76 {approx = true} : vector<8x1xf32> -> vector<8x1xf32>
    %78 = vector.broadcast %77 : vector<8x1xf32> to vector<8x8xf32>
    %79 = arith.mulf %74, %78 : vector<8x8xf32>
    %cst_31 = arith.constant dense<0.000000e+00> : vector<8x8xf32>
    %80 = tpu.matmul %79, %63, %cst_31 {dimension_numbers = #tpu.dot_dimension_numbers<[1], [0], [0], [1], [0, 0, 1, 1], [], []>} : vector<8x8xf32>, vector<8x8xf32>, vector<8x8xf32> -> vector<8x8xf32>
    %81 = arith.truncf %80 : vector<8x8xf32> to vector<8x8xbf16>
    %c2 = arith.constant 2 : index
    %c0_32 = arith.constant 0 : index
    %c0_33 = arith.constant 0 : index
    %82 = vector.load %arg5[%c2, %c0_32, %c0_33] : memref<4x8x32xbf16, #tpu.memory_space<vmem>>, vector<1x8x32xbf16>
    %83 = vector.shape_cast %82 : vector<1x8x32xbf16> to vector<8x32xbf16>
    %cst_34 = arith.constant dense<0.000000e+00> : vector<8x32xf32>
    %84 = tpu.matmul %81, %83, %cst_34 {dimension_numbers = #tpu.dot_dimension_numbers<[1], [0], [0], [1], [0, 0, 1, 1], [], []>} : vector<8x8xbf16>, vector<8x32xbf16>, vector<8x32xf32> -> vector<8x32xf32>
    %85 = arith.addf %60, %84 : vector<8x32xf32>
    %86 = vector.extract_strided_slice %9 {offsets = [0, 24], sizes = [8, 8], strides = [1, 1]} : vector<8x96xf32> to vector<8x8xf32>
    %87 = vector.extract_strided_slice %9 {offsets = [0, 56], sizes = [8, 8], strides = [1, 1]} : vector<8x96xf32> to vector<8x8xf32>
    %88 = vector.extract_strided_slice %9 {offsets = [0, 88], sizes = [8, 8], strides = [1, 1]} : vector<8x96xf32> to vector<8x8xf32>
    %89 = tpu.transpose %87, [1, 0] : vector<8x8xf32> -> vector<8x8xf32>
    %cst_35 = arith.constant dense<0.000000e+00> : vector<8x8xf32>
    %90 = tpu.matmul %86, %89, %cst_35 {dimension_numbers = #tpu.dot_dimension_numbers<[1], [0], [0], [1], [0, 0, 1, 1], [], []>} : vector<8x8xf32>, vector<8x8xf32>, vector<8x8xf32> -> vector<8x8xf32>
    %cst_36 = arith.constant 0.353553385 : f32
    %91 = vector.broadcast %cst_36 : f32 to vector<8x8xf32>
    %92 = arith.mulf %90, %91 : vector<8x8xf32>
    %93 = vector.broadcast %3 : vector<1x8xf32> to vector<8x8xf32>
    %94 = arith.addf %92, %93 : vector<8x8xf32>
    %cst_37 = arith.constant dense<0xFF800000> : vector<8xf32>
    %95 = vector.multi_reduction <maximumf>, %94, %cst_37 [1] : vector<8x8xf32> to vector<8xf32>
    %96 = vector.shape_cast %95 : vector<8xf32> to vector<8x1xf32>
    %97 = vector.broadcast %96 : vector<8x1xf32> to vector<8x8xf32>
    %98 = arith.subf %94, %97 : vector<8x8xf32>
    %99 = math.exp %98 : vector<8x8xf32>
    %cst_38 = arith.constant dense<0.000000e+00> : vector<8xf32>
    %100 = vector.multi_reduction <add>, %99, %cst_38 [1] : vector<8x8xf32> to vector<8xf32>
    %101 = vector.shape_cast %100 : vector<8xf32> to vector<8x1xf32>
    %102 = tpu.reciprocal %101 {approx = true} : vector<8x1xf32> -> vector<8x1xf32>
    %103 = vector.broadcast %102 : vector<8x1xf32> to vector<8x8xf32>
    %104 = arith.mulf %99, %103 : vector<8x8xf32>
    %cst_39 = arith.constant dense<0.000000e+00> : vector<8x8xf32>
    %105 = tpu.matmul %104, %88, %cst_39 {dimension_numbers = #tpu.dot_dimension_numbers<[1], [0], [0], [1], [0, 0, 1, 1], [], []>} : vector<8x8xf32>, vector<8x8xf32>, vector<8x8xf32> -> vector<8x8xf32>
    %106 = arith.truncf %105 : vector<8x8xf32> to vector<8x8xbf16>
    %c3 = arith.constant 3 : index
    %c0_40 = arith.constant 0 : index
    %c0_41 = arith.constant 0 : index
    %107 = vector.load %arg5[%c3, %c0_40, %c0_41] : memref<4x8x32xbf16, #tpu.memory_space<vmem>>, vector<1x8x32xbf16>
    %108 = vector.shape_cast %107 : vector<1x8x32xbf16> to vector<8x32xbf16>
    %cst_42 = arith.constant dense<0.000000e+00> : vector<8x32xf32>
    %109 = tpu.matmul %106, %108, %cst_42 {dimension_numbers = #tpu.dot_dimension_numbers<[1], [0], [0], [1], [0, 0, 1, 1], [], []>} : vector<8x8xbf16>, vector<8x32xbf16>, vector<8x32xf32> -> vector<8x32xf32>
    %110 = arith.addf %85, %109 : vector<8x32xf32>
    %c0_43 = arith.constant 0 : index
    %c0_44 = arith.constant 0 : index
    %111 = vector.load %arg6[%c0_43, %c0_44] : memref<1x32xf32, #tpu.memory_space<vmem>>, vector<1x32xf32>
    %112 = vector.broadcast %111 : vector<1x32xf32> to vector<8x32xf32>
    %113 = arith.addf %110, %112 : vector<8x32xf32>
    %114 = arith.addf %1, %113 : vector<8x32xf32>
    %c0_45 = arith.constant 0 : index
    %c0_46 = arith.constant 0 : index
    %115 = vector.load %arg7[%c0_45, %c0_46] : memref<1x32xf32, #tpu.memory_space<vmem>>, vector<1x32xf32>
    %c0_47 = arith.constant 0 : index
    %c0_48 = arith.constant 0 : index
    %116 = vector.load %arg8[%c0_47, %c0_48] : memref<1x32xf32, #tpu.memory_space<vmem>>, vector<1x32xf32>
    %cst_49 = arith.constant dense<0.000000e+00> : vector<8xf32>
    %117 = vector.multi_reduction <add>, %114, %cst_49 [1] : vector<8x32xf32> to vector<8xf32>
    %118 = vector.shape_cast %117 : vector<8xf32> to vector<8x1xf32>
    %cst_50 = arith.constant 3.200000e+01 : f32
    %119 = vector.broadcast %cst_50 : f32 to vector<8x1xf32>
    %120 = arith.divf %118, %119 : vector<8x1xf32>
    %121 = vector.broadcast %120 : vector<8x1xf32> to vector<8x32xf32>
    %122 = arith.subf %114, %121 : vector<8x32xf32>
    %123 = arith.mulf %122, %122 : vector<8x32xf32>
    %cst_51 = arith.constant dense<0.000000e+00> : vector<8xf32>
    %124 = vector.multi_reduction <add>, %123, %cst_51 [1] : vector<8x32xf32> to vector<8xf32>
    %125 = vector.shape_cast %124 : vector<8xf32> to vector<8x1xf32>
    %cst_52 = arith.constant 3.200000e+01 : f32
    %126 = vector.broadcast %cst_52 : f32 to vector<8x1xf32>
    %127 = arith.divf %125, %126 : vector<8x1xf32>
    %128 = vector.broadcast %120 : vector<8x1xf32> to vector<8x32xf32>
    %129 = arith.subf %114, %128 : vector<8x32xf32>
    %cst_53 = arith.constant 9.99999974E-6 : f32
    %130 = vector.broadcast %cst_53 : f32 to vector<8x1xf32>
    %131 = arith.addf %127, %130 : vector<8x1xf32>
    %132 = math.rsqrt %131 : vector<8x1xf32>
    %133 = vector.broadcast %132 : vector<8x1xf32> to vector<8x32xf32>
    %134 = arith.mulf %129, %133 : vector<8x32xf32>
    %135 = vector.broadcast %115 : vector<1x32xf32> to vector<8x32xf32>
    %136 = arith.mulf %134, %135 : vector<8x32xf32>
    %137 = vector.broadcast %116 : vector<1x32xf32> to vector<8x32xf32>
    %138 = arith.addf %136, %137 : vector<8x32xf32>
    %139 = arith.truncf %138 : vector<8x32xf32> to vector<8x32xbf16>
    %c0_54 = arith.constant 0 : index
    %c0_55 = arith.constant 0 : index
    %140 = vector.load %arg9[%c0_54, %c0_55] : memref<32x64xbf16, #tpu.memory_space<vmem>>, vector<32x64xbf16>
    %cst_56 = arith.constant dense<0.000000e+00> : vector<8x64xf32>
    %141 = tpu.matmul %139, %140, %cst_56 {dimension_numbers = #tpu.dot_dimension_numbers<[1], [0], [0], [1], [0, 0, 1, 1], [], []>} : vector<8x32xbf16>, vector<32x64xbf16>, vector<8x64xf32> -> vector<8x64xf32>
    %c0_57 = arith.constant 0 : index
    %c0_58 = arith.constant 0 : index
    %142 = vector.load %arg10[%c0_57, %c0_58] : memref<1x64xf32, #tpu.memory_space<vmem>>, vector<1x64xf32>
    %143 = vector.broadcast %142 : vector<1x64xf32> to vector<8x64xf32>
    %144 = arith.addf %141, %143 : vector<8x64xf32>
    %145 = arith.mulf %144, %144 : vector<8x64xf32>
    %146 = arith.mulf %144, %145 : vector<8x64xf32>
    %cst_59 = arith.constant 4.471500e-02 : f32
    %147 = vector.broadcast %cst_59 : f32 to vector<8x64xf32>
    %148 = arith.mulf %147, %146 : vector<8x64xf32>
    %149 = arith.addf %144, %148 : vector<8x64xf32>
    %cst_60 = arith.constant 0.797884583 : f32
    %150 = vector.broadcast %cst_60 : f32 to vector<8x64xf32>
    %151 = arith.mulf %150, %149 : vector<8x64xf32>
    %152 = math.tanh %151 : vector<8x64xf32>
    %cst_61 = arith.constant 1.000000e+00 : f32
    %153 = vector.broadcast %cst_61 : f32 to vector<8x64xf32>
    %154 = arith.addf %153, %152 : vector<8x64xf32>
    %cst_62 = arith.constant 5.000000e-01 : f32
    %155 = vector.broadcast %cst_62 : f32 to vector<8x64xf32>
    %156 = arith.mulf %155, %154 : vector<8x64xf32>
    %157 = arith.mulf %144, %156 : vector<8x64xf32>
    %158 = arith.truncf %157 : vector<8x64xf32> to vector<8x64xbf16>
    %c0_63 = arith.constant 0 : index
    %c0_64 = arith.constant 0 : index
    %159 = vector.load %arg11[%c0_63, %c0_64] : memref<64x32xbf16, #tpu.memory_space<vmem>>, vector<64x32xbf16>
    %cst_65 = arith.constant dense<0.000000e+00> : vector<8x32xf32>
    %160 = tpu.matmul %158, %159, %cst_65 {dimension_numbers = #tpu.dot_dimension_numbers<[1], [0], [0], [1], [0, 0, 1, 1], [], []>} : vector<8x64xbf16>, vector<64x32xbf16>, vector<8x32xf32> -> vector<8x32xf32>
    %c0_66 = arith.constant 0 : index
    %c0_67 = arith.constant 0 : index
    %161 = vector.load %arg12[%c0_66, %c0_67] : memref<1x32xf32, #tpu.memory_space<vmem>>, vector<1x32xf32>
    %162 = vector.broadcast %161 : vector<1x32xf32> to vector<8x32xf32>
    %163 = arith.addf %160, %162 : vector<8x32xf32>
    %164 = arith.addf %138, %163 : vector<8x32xf32>
    %c0_68 = arith.constant 0 : index
    %c0_69 = arith.constant 0 : index
    %165 = vector.load %arg13[%c0_68, %c0_69] : memref<1x32xf32, #tpu.memory_space<vmem>>, vector<1x32xf32>
    %c0_70 = arith.constant 0 : index
    %c0_71 = arith.constant 0 : index
    %166 = vector.load %arg14[%c0_70, %c0_71] : memref<1x32xf32, #tpu.memory_space<vmem>>, vector<1x32xf32>
    %cst_72 = arith.constant dense<0.000000e+00> : vector<8xf32>
    %167 = vector.multi_reduction <add>, %164, %cst_72 [1] : vector<8x32xf32> to vector<8xf32>
    %168 = vector.shape_cast %167 : vector<8xf32> to vector<8x1xf32>
    %cst_73 = arith.constant 3.200000e+01 : f32
    %169 = vector.broadcast %cst_73 : f32 to vector<8x1xf32>
    %170 = arith.divf %168, %169 : vector<8x1xf32>
    %171 = vector.broadcast %170 : vector<8x1xf32> to vector<8x32xf32>
    %172 = arith.subf %164, %171 : vector<8x32xf32>
    %173 = arith.mulf %172, %172 : vector<8x32xf32>
    %cst_74 = arith.constant dense<0.000000e+00> : vector<8xf32>
    %174 = vector.multi_reduction <add>, %173, %cst_74 [1] : vector<8x32xf32> to vector<8xf32>
    %175 = vector.shape_cast %174 : vector<8xf32> to vector<8x1xf32>
    %cst_75 = arith.constant 3.200000e+01 : f32
    %176 = vector.broadcast %cst_75 : f32 to vector<8x1xf32>
    %177 = arith.divf %175, %176 : vector<8x1xf32>
    %178 = vector.broadcast %170 : vector<8x1xf32> to vector<8x32xf32>
    %179 = arith.subf %164, %178 : vector<8x32xf32>
    %cst_76 = arith.constant 9.99999974E-6 : f32
    %180 = vector.broadcast %cst_76 : f32 to vector<8x1xf32>
    %181 = arith.addf %177, %180 : vector<8x1xf32>
    %182 = math.rsqrt %181 : vector<8x1xf32>
    %183 = vector.broadcast %182 : vector<8x1xf32> to vector<8x32xf32>
    %184 = arith.mulf %179, %183 : vector<8x32xf32>
    %185 = vector.broadcast %165 : vector<1x32xf32> to vector<8x32xf32>
    %186 = arith.mulf %184, %185 : vector<8x32xf32>
    %187 = vector.broadcast %166 : vector<1x32xf32> to vector<8x32xf32>
    %188 = arith.addf %186, %187 : vector<8x32xf32>
    %c0_77 = arith.constant 0 : index
    %c0_78 = arith.constant 0 : index
    %c0_79 = arith.constant 0 : index
    %189 = vector.load %arg15[%c0_77, %c0_78, %c0_79] : memref<1x8x32xf32, #tpu.memory_space<vmem>>, vector<1x8x32xf32>
    %190 = vector.shape_cast %189 : vector<1x8x32xf32> to vector<8x32xf32>
    %191 = vector.shape_cast %188 : vector<8x32xf32> to vector<1x8x32xf32>
    tpu.vector_store %arg15[%c0_77, %c0_78, %c0_79], %191 {strides = array<i32>} : memref<1x8x32xf32, #tpu.memory_space<vmem>>, vector<1x8x32xf32>,
    return
  }
  func.func @transform_0(%arg0: i32) -> (i32, i32, i32) {
    %c0_i32 = arith.constant 0 : i32
    %c0_i32_0 = arith.constant 0 : i32
    %c0_i32_1 = arith.constant 0 : i32
    return %arg0, %c0_i32, %c0_i32_0 : i32, i32, i32
  }
  func.func @transform_1(%arg0: i32) -> (i32, i32, i32) {
    %c0_i32 = arith.constant 0 : i32
    %c0_i32_0 = arith.constant 0 : i32
    %c0_i32_1 = arith.constant 0 : i32
    return %arg0, %c0_i32, %c0_i32_0 : i32, i32, i32
  }
  func.func @transform_2(%arg0: i32) -> (i32, i32) {
    %c0_i32 = arith.constant 0 : i32
    %c0_i32_0 = arith.constant 0 : i32
    %c0_i32_1 = arith.constant 0 : i32
    return %c0_i32, %c0_i32_0 : i32, i32
  }
  func.func @transform_3(%arg0: i32) -> (i32, i32) {
    %c0_i32 = arith.constant 0 : i32
    %c0_i32_0 = arith.constant 0 : i32
    %c0_i32_1 = arith.constant 0 : i32
    return %c0_i32, %c0_i32_0 : i32, i32
  }
  func.func @transform_4(%arg0: i32) -> (i32, i32, i32) {
    %c0_i32 = arith.constant 0 : i32
    %c0_i32_0 = arith.constant 0 : i32
    %c0_i32_1 = arith.constant 0 : i32
    %c0_i32_2 = arith.constant 0 : i32
    return %c0_i32, %c0_i32_0, %c0_i32_1 : i32, i32, i32
  }
  func.func @transform_5(%arg0: i32) -> (i32, i32) {
    %c0_i32 = arith.constant 0 : i32
    %c0_i32_0 = arith.constant 0 : i32
    %c0_i32_1 = arith.constant 0 : i32
    return %c0_i32, %c0_i32_0 : i32, i32
  }
  func.func @transform_6(%arg0: i32) -> (i32, i32) {
    %c0_i32 = arith.constant 0 : i32
    %c0_i32_0 = arith.constant 0 : i32
    %c0_i32_1 = arith.constant 0 : i32
    return %c0_i32, %c0_i32_0 : i32, i32
  }
  func.func @transform_7(%arg0: i32) -> (i32, i32) {
    %c0_i32 = arith.constant 0 : i32
    %c0_i32_0 = arith.constant 0 : i32
    %c0_i32_1 = arith.constant 0 : i32
    return %c0_i32, %c0_i32_0 : i32, i32
  }
  func.func @transform_8(%arg0: i32) -> (i32, i32) {
    %c0_i32 = arith.constant 0 : i32
    %c0_i32_0 = arith.constant 0 : i32
    %c0_i32_1 = arith.constant 0 : i32
    return %c0_i32, %c0_i32_0 : i32, i32
  }
  func.func @transform_9(%arg0: i32) -> (i32, i32) {
    %c0_i32 = arith.constant 0 : i32
    %c0_i32_0 = arith.constant 0 : i32
    %c0_i32_1 = arith.constant 0 : i32
    return %c0_i32, %c0_i32_0 : i32, i32
  }
  func.func @transform_10(%arg0: i32) -> (i32, i32) {
    %c0_i32 = arith.constant 0 : i32
    %c0_i32_0 = arith.constant 0 : i32
    %c0_i32_1 = arith.constant 0 : i32
    return %c0_i32, %c0_i32_0 : i32, i32
  }
  func.func @transform_11(%arg0: i32) -> (i32, i32) {
    %c0_i32 = arith.constant 0 : i32
    %c0_i32_0 = arith.constant 0 : i32
    %c0_i32_1 = arith.constant 0 : i32
    return %c0_i32, %c0_i32_0 : i32, i32
  }
  func.func @transform_12(%arg0: i32) -> (i32, i32) {
    %c0_i32 = arith.constant 0 : i32
    %c0_i32_0 = arith.constant 0 : i32
    %c0_i32_1 = arith.constant 0 : i32
    return %c0_i32, %c0_i32_0 : i32, i32
  }
  func.func @transform_13(%arg0: i32) -> (i32, i32) {
    %c0_i32 = arith.constant 0 : i32
    %c0_i32_0 = arith.constant 0 : i32
    %c0_i32_1 = arith.constant 0 : i32
    return %c0_i32, %c0_i32_0 : i32, i32
  }
  func.func @transform_14(%arg0: i32) -> (i32, i32, i32) {
    %c0_i32 = arith.constant 0 : i32
    %c0_i32_0 = arith.constant 0 : i32
    %c0_i32_1 = arith.constant 0 : i32
    return %arg0, %c0_i32, %c0_i32_0 : i32, i32, i32
  }
}

module attributes {stable_mosaic.version = 11 : i64} {
  func.func @_transformer_layer_kernel(%arg0: i32, %arg1: memref<1x8x32xf32, #tpu.memory_space<vmem>>, %arg2: memref<1x1x8xf32, #tpu.memory_space<vmem>>, %arg3: memref<32x96xbf16, #tpu.memory_space<vmem>>, %arg4: memref<1x96xf32, #tpu.memory_space<vmem>>, %arg5: memref<4x8x32xbf16, #tpu.memory_space<vmem>>, %arg6: memref<1x32xf32, #tpu.memory_space<vmem>>, %arg7: memref<1x32xf32, #tpu.memory_space<vmem>>, %arg8: memref<1x32xf32, #tpu.memory_space<vmem>>, %arg9: memref<32x64xbf16, #tpu.memory_space<vmem>>, %arg10: memref<1x64xf32, #tpu.memory_space<vmem>>, %arg11: memref<64x32xbf16, #tpu.memory_space<vmem>>, %arg12: memref<1x32xf32, #tpu.memory_space<vmem>>, %arg13: memref<1x32xf32, #tpu.memory_space<vmem>>, %arg14: memref<1x32xf32, #tpu.memory_space<vmem>>, %arg15: memref<1x8x32xf32, #tpu.memory_space<vmem>>) attributes {dimension_semantics = [#tpu.dimension_semantics<parallel>], iteration_bounds = array<i64: 2>, scalar_prefetch = 0 : i64, scratch_operands = 0 : i64, tpu.core_type = #tpu.core_type<tc>, window_params = [{transform_indices = @transform_0, window_bounds = array<i64: 1, 8, 32>}, {transform_indices = @transform_1, window_bounds = array<i64: 1, 1, 8>}, {pipeline_mode = #tpu.pipeline_mode<synchronous>, transform_indices = @transform_2, window_bounds = array<i64: 32, 96>}, {pipeline_mode = #tpu.pipeline_mode<synchronous>, transform_indices = @transform_3, window_bounds = array<i64: 1, 96>}, {pipeline_mode = #tpu.pipeline_mode<synchronous>, transform_indices = @transform_4, window_bounds = array<i64: 4, 8, 32>}, {pipeline_mode = #tpu.pipeline_mode<synchronous>, transform_indices = @transform_5, window_bounds = array<i64: 1, 32>}, {pipeline_mode = #tpu.pipeline_mode<synchronous>, transform_indices = @transform_6, window_bounds = array<i64: 1, 32>}, {pipeline_mode = #tpu.pipeline_mode<synchronous>, transform_indices = @transform_7, window_bounds = array<i64: 1, 32>}, {pipeline_mode = #tpu.pipeline_mode<synchronous>, transform_indices = @transform_8, window_bounds = array<i64: 32, 64>}, {pipeline_mode = #tpu.pipeline_mode<synchronous>, transform_indices = @transform_9, window_bounds = array<i64: 1, 64>}, {pipeline_mode = #tpu.pipeline_mode<synchronous>, transform_indices = @transform_10, window_bounds = array<i64: 64, 32>}, {pipeline_mode = #tpu.pipeline_mode<synchronous>, transform_indices = @transform_11, window_bounds = array<i64: 1, 32>}, {pipeline_mode = #tpu.pipeline_mode<synchronous>, transform_indices = @transform_12, window_bounds = array<i64: 1, 32>}, {pipeline_mode = #tpu.pipeline_mode<synchronous>, transform_indices = @transform_13, window_bounds = array<i64: 1, 32>}, {transform_indices = @transform_14, window_bounds = array<i64: 1, 8, 32>}]} {
    %c0 = arith.constant 0 : index
    %c0_0 = arith.constant 0 : index
    %c0_1 = arith.constant 0 : index
    %0 = vector.load %arg1[%c0, %c0_0, %c0_1] : memref<1x8x32xf32, #tpu.memory_space<vmem>>, vector<1x8x32xf32>
    %1 = vector.shape_cast %0 : vector<1x8x32xf32> to vector<8x32xf32>
    %c0_2 = arith.constant 0 : index
    %c0_3 = arith.constant 0 : index
    %c0_4 = arith.constant 0 : index
    %2 = vector.load %arg2[%c0_2, %c0_3, %c0_4] : memref<1x1x8xf32, #tpu.memory_space<vmem>>, vector<1x1x8xf32>
    %3 = vector.shape_cast %2 : vector<1x1x8xf32> to vector<1x8xf32>
    %4 = arith.truncf %1 : vector<8x32xf32> to vector<8x32xbf16>
    %c0_5 = arith.constant 0 : index
    %c0_6 = arith.constant 0 : index
    %5 = vector.load %arg3[%c0_5, %c0_6] : memref<32x96xbf16, #tpu.memory_space<vmem>>, vector<32x96xbf16>
    %cst = arith.constant dense<0.000000e+00> : vector<8x96xf32>
    %6 = tpu.matmul %4, %5, %cst {dimension_numbers = #tpu.dot_dimension_numbers<[1], [0], [0], [1], [0, 0, 1, 1], [], []>} : vector<8x32xbf16>, vector<32x96xbf16>, vector<8x96xf32> -> vector<8x96xf32>
    %c0_7 = arith.constant 0 : index
    %c0_8 = arith.constant 0 : index
    %7 = vector.load %arg4[%c0_7, %c0_8] : memref<1x96xf32, #tpu.memory_space<vmem>>, vector<1x96xf32>
    %8 = vector.broadcast %7 : vector<1x96xf32> to vector<8x96xf32>
    %9 = arith.addf %6, %8 : vector<8x96xf32>
    %cst_9 = arith.constant 0.000000e+00 : f32
    %10 = vector.broadcast %cst_9 : f32 to vector<8x32xf32>
    %11 = vector.extract_strided_slice %9 {offsets = [0, 0], sizes = [8, 8], strides = [1, 1]} : vector<8x96xf32> to vector<8x8xf32>
    %12 = vector.extract_strided_slice %9 {offsets = [0, 32], sizes = [8, 8], strides = [1, 1]} : vector<8x96xf32> to vector<8x8xf32>
    %13 = vector.extract_strided_slice %9 {offsets = [0, 64], sizes = [8, 8], strides = [1, 1]} : vector<8x96xf32> to vector<8x8xf32>
    %14 = tpu.transpose %12, [1, 0] : vector<8x8xf32> -> vector<8x8xf32>
    %cst_10 = arith.constant dense<0.000000e+00> : vector<8x8xf32>
    %15 = tpu.matmul %11, %14, %cst_10 {dimension_numbers = #tpu.dot_dimension_numbers<[1], [0], [0], [1], [0, 0, 1, 1], [], []>} : vector<8x8xf32>, vector<8x8xf32>, vector<8x8xf32> -> vector<8x8xf32>
    %cst_11 = arith.constant 0.353553385 : f32
    %16 = vector.broadcast %cst_11 : f32 to vector<8x8xf32>
    %17 = arith.mulf %15, %16 : vector<8x8xf32>
    %18 = vector.broadcast %3 : vector<1x8xf32> to vector<8x8xf32>
    %19 = arith.addf %17, %18 : vector<8x8xf32>
    %cst_12 = arith.constant dense<0xFF800000> : vector<8xf32>
    %20 = vector.multi_reduction <maximumf>, %19, %cst_12 [1] : vector<8x8xf32> to vector<8xf32>
    %21 = vector.shape_cast %20 : vector<8xf32> to vector<8x1xf32>
    %22 = vector.broadcast %21 : vector<8x1xf32> to vector<8x8xf32>
    %23 = arith.subf %19, %22 : vector<8x8xf32>
    %24 = math.exp %23 : vector<8x8xf32>
    %cst_13 = arith.constant dense<0.000000e+00> : vector<8xf32>
    %25 = vector.multi_reduction <add>, %24, %cst_13 [1] : vector<8x8xf32> to vector<8xf32>
    %26 = vector.shape_cast %25 : vector<8xf32> to vector<8x1xf32>
    %27 = tpu.reciprocal %26 {approx = true} : vector<8x1xf32> -> vector<8x1xf32>
    %28 = vector.broadcast %27 : vector<8x1xf32> to vector<8x8xf32>
    %29 = arith.mulf %24, %28 : vector<8x8xf32>
    %cst_14 = arith.constant dense<0.000000e+00> : vector<8x8xf32>
    %30 = tpu.matmul %29, %13, %cst_14 {dimension_numbers = #tpu.dot_dimension_numbers<[1], [0], [0], [1], [0, 0, 1, 1], [], []>} : vector<8x8xf32>, vector<8x8xf32>, vector<8x8xf32> -> vector<8x8xf32>
    %31 = arith.truncf %30 : vector<8x8xf32> to vector<8x8xbf16>
    %c0_15 = arith.constant 0 : index
    %c0_16 = arith.constant 0 : index
    %c0_17 = arith.constant 0 : index
    %32 = vector.load %arg5[%c0_15, %c0_16, %c0_17] : memref<4x8x32xbf16, #tpu.memory_space<vmem>>, vector<1x8x32xbf16>
    %33 = vector.shape_cast %32 : vector<1x8x32xbf16> to vector<8x32xbf16>
    %cst_18 = arith.constant dense<0.000000e+00> : vector<8x32xf32>
    %34 = tpu.matmul %31, %33, %cst_18 {dimension_numbers = #tpu.dot_dimension_numbers<[1], [0], [0], [1], [0, 0, 1, 1], [], []>} : vector<8x8xbf16>, vector<8x32xbf16>, vector<8x32xf32> -> vector<8x32xf32>
    %35 = arith.addf %10, %34 : vector<8x32xf32>
    %36 = vector.extract_strided_slice %9 {offsets = [0, 8], sizes = [8, 8], strides = [1, 1]} : vector<8x96xf32> to vector<8x8xf32>
    %37 = vector.extract_strided_slice %9 {offsets = [0, 40], sizes = [8, 8], strides = [1, 1]} : vector<8x96xf32> to vector<8x8xf32>
    %38 = vector.extract_strided_slice %9 {offsets = [0, 72], sizes = [8, 8], strides = [1, 1]} : vector<8x96xf32> to vector<8x8xf32>
    %39 = tpu.transpose %37, [1, 0] : vector<8x8xf32> -> vector<8x8xf32>
    %cst_19 = arith.constant dense<0.000000e+00> : vector<8x8xf32>
    %40 = tpu.matmul %36, %39, %cst_19 {dimension_numbers = #tpu.dot_dimension_numbers<[1], [0], [0], [1], [0, 0, 1, 1], [], []>} : vector<8x8xf32>, vector<8x8xf32>, vector<8x8xf32> -> vector<8x8xf32>
    %cst_20 = arith.constant 0.353553385 : f32
    %41 = vector.broadcast %cst_20 : f32 to vector<8x8xf32>
    %42 = arith.mulf %40, %41 : vector<8x8xf32>
    %43 = vector.broadcast %3 : vector<1x8xf32> to vector<8x8xf32>
    %44 = arith.addf %42, %43 : vector<8x8xf32>
    %cst_21 = arith.constant dense<0xFF800000> : vector<8xf32>
    %45 = vector.multi_reduction <maximumf>, %44, %cst_21 [1] : vector<8x8xf32> to vector<8xf32>
    %46 = vector.shape_cast %45 : vector<8xf32> to vector<8x1xf32>
    %47 = vector.broadcast %46 : vector<8x1xf32> to vector<8x8xf32>
    %48 = arith.subf %44, %47 : vector<8x8xf32>
    %49 = math.exp %48 : vector<8x8xf32>
    %cst_22 = arith.constant dense<0.000000e+00> : vector<8xf32>
    %50 = vector.multi_reduction <add>, %49, %cst_22 [1] : vector<8x8xf32> to vector<8xf32>
    %51 = vector.shape_cast %50 : vector<8xf32> to vector<8x1xf32>
    %52 = tpu.reciprocal %51 {approx = true} : vector<8x1xf32> -> vector<8x1xf32>
    %53 = vector.broadcast %52 : vector<8x1xf32> to vector<8x8xf32>
    %54 = arith.mulf %49, %53 : vector<8x8xf32>
    %cst_23 = arith.constant dense<0.000000e+00> : vector<8x8xf32>
    %55 = tpu.matmul %54, %38, %cst_23 {dimension_numbers = #tpu.dot_dimension_numbers<[1], [0], [0], [1], [0, 0, 1, 1], [], []>} : vector<8x8xf32>, vector<8x8xf32>, vector<8x8xf32> -> vector<8x8xf32>
    %56 = arith.truncf %55 : vector<8x8xf32> to vector<8x8xbf16>
    %c1 = arith.constant 1 : index
    %c0_24 = arith.constant 0 : index
    %c0_25 = arith.constant 0 : index
    %57 = vector.load %arg5[%c1, %c0_24, %c0_25] : memref<4x8x32xbf16, #tpu.memory_space<vmem>>, vector<1x8x32xbf16>
    %58 = vector.shape_cast %57 : vector<1x8x32xbf16> to vector<8x32xbf16>
    %cst_26 = arith.constant dense<0.000000e+00> : vector<8x32xf32>
    %59 = tpu.matmul %56, %58, %cst_26 {dimension_numbers = #tpu.dot_dimension_numbers<[1], [0], [0], [1], [0, 0, 1, 1], [], []>} : vector<8x8xbf16>, vector<8x32xbf16>, vector<8x32xf32> -> vector<8x32xf32>
    %60 = arith.addf %35, %59 : vector<8x32xf32>
    %61 = vector.extract_strided_slice %9 {offsets = [0, 16], sizes = [8, 8], strides = [1, 1]} : vector<8x96xf32> to vector<8x8xf32>
    %62 = vector.extract_strided_slice %9 {offsets = [0, 48], sizes = [8, 8], strides = [1, 1]} : vector<8x96xf32> to vector<8x8xf32>
    %63 = vector.extract_strided_slice %9 {offsets = [0, 80], sizes = [8, 8], strides = [1, 1]} : vector<8x96xf32> to vector<8x8xf32>
    %64 = tpu.transpose %62, [1, 0] : vector<8x8xf32> -> vector<8x8xf32>
    %cst_27 = arith.constant dense<0.000000e+00> : vector<8x8xf32>
    %65 = tpu.matmul %61, %64, %cst_27 {dimension_numbers = #tpu.dot_dimension_numbers<[1], [0], [0], [1], [0, 0, 1, 1], [], []>} : vector<8x8xf32>, vector<8x8xf32>, vector<8x8xf32> -> vector<8x8xf32>
    %cst_28 = arith.constant 0.353553385 : f32
    %66 = vector.broadcast %cst_28 : f32 to vector<8x8xf32>
    %67 = arith.mulf %65, %66 : vector<8x8xf32>
    %68 = vector.broadcast %3 : vector<1x8xf32> to vector<8x8xf32>
    %69 = arith.addf %67, %68 : vector<8x8xf32>
    %cst_29 = arith.constant dense<0xFF800000> : vector<8xf32>
    %70 = vector.multi_reduction <maximumf>, %69, %cst_29 [1] : vector<8x8xf32> to vector<8xf32>
    %71 = vector.shape_cast %70 : vector<8xf32> to vector<8x1xf32>
    %72 = vector.broadcast %71 : vector<8x1xf32> to vector<8x8xf32>
    %73 = arith.subf %69, %72 : vector<8x8xf32>
    %74 = math.exp %73 : vector<8x8xf32>
    %cst_30 = arith.constant dense<0.000000e+00> : vector<8xf32>
    %75 = vector.multi_reduction <add>, %74, %cst_30 [1] : vector<8x8xf32> to vector<8xf32>
    %76 = vector.shape_cast %75 : vector<8xf32> to vector<8x1xf32>
    %77 = tpu.reciprocal %76 {approx = true} : vector<8x1xf32> -> vector<8x1xf32>
    %78 = vector.broadcast %77 : vector<8x1xf32> to vector<8x8xf32>
    %79 = arith.mulf %74, %78 : vector<8x8xf32>
    %cst_31 = arith.constant dense<0.000000e+00> : vector<8x8xf32>
    %80 = tpu.matmul %79, %63, %cst_31 {dimension_numbers = #tpu.dot_dimension_numbers<[1], [0], [0], [1], [0, 0, 1, 1], [], []>} : vector<8x8xf32>, vector<8x8xf32>, vector<8x8xf32> -> vector<8x8xf32>
    %81 = arith.truncf %80 : vector<8x8xf32> to vector<8x8xbf16>
    %c2 = arith.constant 2 : index
    %c0_32 = arith.constant 0 : index
    %c0_33 = arith.constant 0 : index
    %82 = vector.load %arg5[%c2, %c0_32, %c0_33] : memref<4x8x32xbf16, #tpu.memory_space<vmem>>, vector<1x8x32xbf16>
    %83 = vector.shape_cast %82 : vector<1x8x32xbf16> to vector<8x32xbf16>
    %cst_34 = arith.constant dense<0.000000e+00> : vector<8x32xf32>
    %84 = tpu.matmul %81, %83, %cst_34 {dimension_numbers = #tpu.dot_dimension_numbers<[1], [0], [0], [1], [0, 0, 1, 1], [], []>} : vector<8x8xbf16>, vector<8x32xbf16>, vector<8x32xf32> -> vector<8x32xf32>
    %85 = arith.addf %60, %84 : vector<8x32xf32>
    %86 = vector.extract_strided_slice %9 {offsets = [0, 24], sizes = [8, 8], strides = [1, 1]} : vector<8x96xf32> to vector<8x8xf32>
    %87 = vector.extract_strided_slice %9 {offsets = [0, 56], sizes = [8, 8], strides = [1, 1]} : vector<8x96xf32> to vector<8x8xf32>
    %88 = vector.extract_strided_slice %9 {offsets = [0, 88], sizes = [8, 8], strides = [1, 1]} : vector<8x96xf32> to vector<8x8xf32>
    %89 = tpu.transpose %87, [1, 0] : vector<8x8xf32> -> vector<8x8xf32>
    %cst_35 = arith.constant dense<0.000000e+00> : vector<8x8xf32>
    %90 = tpu.matmul %86, %89, %cst_35 {dimension_numbers = #tpu.dot_dimension_numbers<[1], [0], [0], [1], [0, 0, 1, 1], [], []>} : vector<8x8xf32>, vector<8x8xf32>, vector<8x8xf32> -> vector<8x8xf32>
    %cst_36 = arith.constant 0.353553385 : f32
    %91 = vector.broadcast %cst_36 : f32 to vector<8x8xf32>
    %92 = arith.mulf %90, %91 : vector<8x8xf32>
    %93 = vector.broadcast %3 : vector<1x8xf32> to vector<8x8xf32>
    %94 = arith.addf %92, %93 : vector<8x8xf32>
    %cst_37 = arith.constant dense<0xFF800000> : vector<8xf32>
    %95 = vector.multi_reduction <maximumf>, %94, %cst_37 [1] : vector<8x8xf32> to vector<8xf32>
    %96 = vector.shape_cast %95 : vector<8xf32> to vector<8x1xf32>
    %97 = vector.broadcast %96 : vector<8x1xf32> to vector<8x8xf32>
    %98 = arith.subf %94, %97 : vector<8x8xf32>
    %99 = math.exp %98 : vector<8x8xf32>
    %cst_38 = arith.constant dense<0.000000e+00> : vector<8xf32>
    %100 = vector.multi_reduction <add>, %99, %cst_38 [1] : vector<8x8xf32> to vector<8xf32>
    %101 = vector.shape_cast %100 : vector<8xf32> to vector<8x1xf32>
    %102 = tpu.reciprocal %101 {approx = true} : vector<8x1xf32> -> vector<8x1xf32>
    %103 = vector.broadcast %102 : vector<8x1xf32> to vector<8x8xf32>
    %104 = arith.mulf %99, %103 : vector<8x8xf32>
    %cst_39 = arith.constant dense<0.000000e+00> : vector<8x8xf32>
    %105 = tpu.matmul %104, %88, %cst_39 {dimension_numbers = #tpu.dot_dimension_numbers<[1], [0], [0], [1], [0, 0, 1, 1], [], []>} : vector<8x8xf32>, vector<8x8xf32>, vector<8x8xf32> -> vector<8x8xf32>
    %106 = arith.truncf %105 : vector<8x8xf32> to vector<8x8xbf16>
    %c3 = arith.constant 3 : index
    %c0_40 = arith.constant 0 : index
    %c0_41 = arith.constant 0 : index
    %107 = vector.load %arg5[%c3, %c0_40, %c0_41] : memref<4x8x32xbf16, #tpu.memory_space<vmem>>, vector<1x8x32xbf16>
    %108 = vector.shape_cast %107 : vector<1x8x32xbf16> to vector<8x32xbf16>
    %cst_42 = arith.constant dense<0.000000e+00> : vector<8x32xf32>
    %109 = tpu.matmul %106, %108, %cst_42 {dimension_numbers = #tpu.dot_dimension_numbers<[1], [0], [0], [1], [0, 0, 1, 1], [], []>} : vector<8x8xbf16>, vector<8x32xbf16>, vector<8x32xf32> -> vector<8x32xf32>
    %110 = arith.addf %85, %109 : vector<8x32xf32>
    %c0_43 = arith.constant 0 : index
    %c0_44 = arith.constant 0 : index
    %111 = vector.load %arg6[%c0_43, %c0_44] : memref<1x32xf32, #tpu.memory_space<vmem>>, vector<1x32xf32>
    %112 = vector.broadcast %111 : vector<1x32xf32> to vector<8x32xf32>
    %113 = arith.addf %110, %112 : vector<8x32xf32>
    %114 = arith.addf %1, %113 : vector<8x32xf32>
    %c0_45 = arith.constant 0 : index
    %c0_46 = arith.constant 0 : index
    %115 = vector.load %arg7[%c0_45, %c0_46] : memref<1x32xf32, #tpu.memory_space<vmem>>, vector<1x32xf32>
    %c0_47 = arith.constant 0 : index
    %c0_48 = arith.constant 0 : index
    %116 = vector.load %arg8[%c0_47, %c0_48] : memref<1x32xf32, #tpu.memory_space<vmem>>, vector<1x32xf32>
    %cst_49 = arith.constant dense<0.000000e+00> : vector<8xf32>
    %117 = vector.multi_reduction <add>, %114, %cst_49 [1] : vector<8x32xf32> to vector<8xf32>
    %118 = vector.shape_cast %117 : vector<8xf32> to vector<8x1xf32>
    %cst_50 = arith.constant 3.200000e+01 : f32
    %119 = vector.broadcast %cst_50 : f32 to vector<8x1xf32>
    %120 = arith.divf %118, %119 : vector<8x1xf32>
    %121 = vector.broadcast %120 : vector<8x1xf32> to vector<8x32xf32>
    %122 = arith.subf %114, %121 : vector<8x32xf32>
    %123 = arith.mulf %122, %122 : vector<8x32xf32>
    %cst_51 = arith.constant dense<0.000000e+00> : vector<8xf32>
    %124 = vector.multi_reduction <add>, %123, %cst_51 [1] : vector<8x32xf32> to vector<8xf32>
    %125 = vector.shape_cast %124 : vector<8xf32> to vector<8x1xf32>
    %cst_52 = arith.constant 3.200000e+01 : f32
    %126 = vector.broadcast %cst_52 : f32 to vector<8x1xf32>
    %127 = arith.divf %125, %126 : vector<8x1xf32>
    %128 = vector.broadcast %120 : vector<8x1xf32> to vector<8x32xf32>
    %129 = arith.subf %114, %128 : vector<8x32xf32>
    %cst_53 = arith.constant 9.99999974E-6 : f32
    %130 = vector.broadcast %cst_53 : f32 to vector<8x1xf32>
    %131 = arith.addf %127, %130 : vector<8x1xf32>
    %132 = math.rsqrt %131 : vector<8x1xf32>
    %133 = vector.broadcast %132 : vector<8x1xf32> to vector<8x32xf32>
    %134 = arith.mulf %129, %133 : vector<8x32xf32>
    %135 = vector.broadcast %115 : vector<1x32xf32> to vector<8x32xf32>
    %136 = arith.mulf %134, %135 : vector<8x32xf32>
    %137 = vector.broadcast %116 : vector<1x32xf32> to vector<8x32xf32>
    %138 = arith.addf %136, %137 : vector<8x32xf32>
    %139 = arith.truncf %138 : vector<8x32xf32> to vector<8x32xbf16>
    %c0_54 = arith.constant 0 : index
    %c0_55 = arith.constant 0 : index
    %140 = vector.load %arg9[%c0_54, %c0_55] : memref<32x64xbf16, #tpu.memory_space<vmem>>, vector<32x64xbf16>
    %cst_56 = arith.constant dense<0.000000e+00> : vector<8x64xf32>
    %141 = tpu.matmul %139, %140, %cst_56 {dimension_numbers = #tpu.dot_dimension_numbers<[1], [0], [0], [1], [0, 0, 1, 1], [], []>} : vector<8x32xbf16>, vector<32x64xbf16>, vector<8x64xf32> -> vector<8x64xf32>
    %c0_57 = arith.constant 0 : index
    %c0_58 = arith.constant 0 : index
    %142 = vector.load %arg10[%c0_57, %c0_58] : memref<1x64xf32, #tpu.memory_space<vmem>>, vector<1x64xf32>
    %143 = vector.broadcast %142 : vector<1x64xf32> to vector<8x64xf32>
    %144 = arith.addf %141, %143 : vector<8x64xf32>
    %145 = arith.mulf %144, %144 : vector<8x64xf32>
    %146 = arith.mulf %144, %145 : vector<8x64xf32>
    %cst_59 = arith.constant 4.471500e-02 : f32
    %147 = vector.broadcast %cst_59 : f32 to vector<8x64xf32>
    %148 = arith.mulf %147, %146 : vector<8x64xf32>
    %149 = arith.addf %144, %148 : vector<8x64xf32>
    %cst_60 = arith.constant 0.797884583 : f32
    %150 = vector.broadcast %cst_60 : f32 to vector<8x64xf32>
    %151 = arith.mulf %150, %149 : vector<8x64xf32>
    %152 = math.tanh %151 : vector<8x64xf32>
    %cst_61 = arith.constant 1.000000e+00 : f32
    %153 = vector.broadcast %cst_61 : f32 to vector<8x64xf32>
    %154 = arith.addf %153, %152 : vector<8x64xf32>
    %cst_62 = arith.constant 5.000000e-01 : f32
    %155 = vector.broadcast %cst_62 : f32 to vector<8x64xf32>
    %156 = arith.mulf %155, %154 : vector<8x64xf32>
    %157 = arith.mulf %144, %156 : vector<8x64xf32>
    %158 = arith.truncf %157 : vector<8x64xf32> to vector<8x64xbf16>
    %c0_63 = arith.constant 0 : index
    %c0_64 = arith.constant 0 : index
    %159 = vector.load %arg11[%c0_63, %c0_64] : memref<64x32xbf16, #tpu.memory_space<vmem>>, vector<64x32xbf16>
    %cst_65 = arith.constant dense<0.000000e+00> : vector<8x32xf32>
    %160 = tpu.matmul %158, %159, %cst_65 {dimension_numbers = #tpu.dot_dimension_numbers<[1], [0], [0], [1], [0, 0, 1, 1], [], []>} : vector<8x64xbf16>, vector<64x32xbf16>, vector<8x32xf32> -> vector<8x32xf32>
    %c0_66 = arith.constant 0 : index
    %c0_67 = arith.constant 0 : index
    %161 = vector.load %arg12[%c0_66, %c0_67] : memref<1x32xf32, #tpu.memory_space<vmem>>, vector<1x32xf32>
    %162 = vector.broadcast %161 : vector<1x32xf32> to vector<8x32xf32>
    %163 = arith.addf %160, %162 : vector<8x32xf32>
    %164 = arith.addf %138, %163 : vector<8x32xf32>
    %c0_68 = arith.constant 0 : index
    %c0_69 = arith.constant 0 : index
    %165 = vector.load %arg13[%c0_68, %c0_69] : memref<1x32xf32, #tpu.memory_space<vmem>>, vector<1x32xf32>
    %c0_70 = arith.constant 0 : index
    %c0_71 = arith.constant 0 : index
    %166 = vector.load %arg14[%c0_70, %c0_71] : memref<1x32xf32, #tpu.memory_space<vmem>>, vector<1x32xf32>
    %cst_72 = arith.constant dense<0.000000e+00> : vector<8xf32>
    %167 = vector.multi_reduction <add>, %164, %cst_72 [1] : vector<8x32xf32> to vector<8xf32>
    %168 = vector.shape_cast %167 : vector<8xf32> to vector<8x1xf32>
    %cst_73 = arith.constant 3.200000e+01 : f32
    %169 = vector.broadcast %cst_73 : f32 to vector<8x1xf32>
    %170 = arith.divf %168, %169 : vector<8x1xf32>
    %171 = vector.broadcast %170 : vector<8x1xf32> to vector<8x32xf32>
    %172 = arith.subf %164, %171 : vector<8x32xf32>
    %173 = arith.mulf %172, %172 : vector<8x32xf32>
    %cst_74 = arith.constant dense<0.000000e+00> : vector<8xf32>
    %174 = vector.multi_reduction <add>, %173, %cst_74 [1] : vector<8x32xf32> to vector<8xf32>
    %175 = vector.shape_cast %174 : vector<8xf32> to vector<8x1xf32>
    %cst_75 = arith.constant 3.200000e+01 : f32
    %176 = vector.broadcast %cst_75 : f32 to vector<8x1xf32>
    %177 = arith.divf %175, %176 : vector<8x1xf32>
    %178 = vector.broadcast %170 : vector<8x1xf32> to vector<8x32xf32>
    %179 = arith.subf %164, %178 : vector<8x32xf32>
    %cst_76 = arith.constant 9.99999974E-6 : f32
    %180 = vector.broadcast %cst_76 : f32 to vector<8x1xf32>
    %181 = arith.addf %177, %180 : vector<8x1xf32>
    %182 = math.rsqrt %181 : vector<8x1xf32>
    %183 = vector.broadcast %182 : vector<8x1xf32> to vector<8x32xf32>
    %184 = arith.mulf %179, %183 : vector<8x32xf32>
    %185 = vector.broadcast %165 : vector<1x32xf32> to vector<8x32xf32>
    %186 = arith.mulf %184, %185 : vector<8x32xf32>
    %187 = vector.broadcast %166 : vector<1x32xf32> to vector<8x32xf32>
    %188 = arith.addf %186, %187 : vector<8x32xf32>
    %c0_77 = arith.constant 0 : index
    %c0_78 = arith.constant 0 : index
    %c0_79 = arith.constant 0 : index
    %189 = vector.load %arg15[%c0_77, %c0_78, %c0_79] : memref<1x8x32xf32, #tpu.memory_space<vmem>>, vector<1x8x32xf32>
    %190 = vector.shape_cast %189 : vector<1x8x32xf32> to vector<8x32xf32>
    %191 = vector.shape_cast %188 : vector<8x32xf32> to vector<1x8x32xf32>
    tpu.vector_store %arg15[%c0_77, %c0_78, %c0_79], %191 {strides = array<i32>} : memref<1x8x32xf32, #tpu.memory_space<vmem>>, vector<1x8x32xf32>,
    return
  }
  func.func @transform_0(%arg0: i32) -> (i32, i32, i32) {
    %c0_i32 = arith.constant 0 : i32
    %c0_i32_0 = arith.constant 0 : i32
    %c0_i32_1 = arith.constant 0 : i32
    return %arg0, %c0_i32, %c0_i32_0 : i32, i32, i32
  }
  func.func @transform_1(%arg0: i32) -> (i32, i32, i32) {
    %c0_i32 = arith.constant 0 : i32
    %c0_i32_0 = arith.constant 0 : i32
    %c0_i32_1 = arith.constant 0 : i32
    return %arg0, %c0_i32, %c0_i32_0 : i32, i32, i32
  }
  func.func @transform_2(%arg0: i32) -> (i32, i32) {
    %c0_i32 = arith.constant 0 : i32
    %c0_i32_0 = arith.constant 0 : i32
    %c0_i32_1 = arith.constant 0 : i32
    return %c0_i32, %c0_i32_0 : i32, i32
  }
  func.func @transform_3(%arg0: i32) -> (i32, i32) {
    %c0_i32 = arith.constant 0 : i32
    %c0_i32_0 = arith.constant 0 : i32
    %c0_i32_1 = arith.constant 0 : i32
    return %c0_i32, %c0_i32_0 : i32, i32
  }
  func.func @transform_4(%arg0: i32) -> (i32, i32, i32) {
    %c0_i32 = arith.constant 0 : i32
    %c0_i32_0 = arith.constant 0 : i32
    %c0_i32_1 = arith.constant 0 : i32
    %c0_i32_2 = arith.constant 0 : i32
    return %c0_i32, %c0_i32_0, %c0_i32_1 : i32, i32, i32
  }
  func.func @transform_5(%arg0: i32) -> (i32, i32) {
    %c0_i32 = arith.constant 0 : i32
    %c0_i32_0 = arith.constant 0 : i32
    %c0_i32_1 = arith.constant 0 : i32
    return %c0_i32, %c0_i32_0 : i32, i32
  }
  func.func @transform_6(%arg0: i32) -> (i32, i32) {
    %c0_i32 = arith.constant 0 : i32
    %c0_i32_0 = arith.constant 0 : i32
    %c0_i32_1 = arith.constant 0 : i32
    return %c0_i32, %c0_i32_0 : i32, i32
  }
  func.func @transform_7(%arg0: i32) -> (i32, i32) {
    %c0_i32 = arith.constant 0 : i32
    %c0_i32_0 = arith.constant 0 : i32
    %c0_i32_1 = arith.constant 0 : i32
    return %c0_i32, %c0_i32_0 : i32, i32
  }
  func.func @transform_8(%arg0: i32) -> (i32, i32) {
    %c0_i32 = arith.constant 0 : i32
    %c0_i32_0 = arith.constant 0 : i32
    %c0_i32_1 = arith.constant 0 : i32
    return %c0_i32, %c0_i32_0 : i32, i32
  }
  func.func @transform_9(%arg0: i32) -> (i32, i32) {
    %c0_i32 = arith.constant 0 : i32
    %c0_i32_0 = arith.constant 0 : i32
    %c0_i32_1 = arith.constant 0 : i32
    return %c0_i32, %c0_i32_0 : i32, i32
  }
  func.func @transform_10(%arg0: i32) -> (i32, i32) {
    %c0_i32 = arith.constant 0 : i32
    %c0_i32_0 = arith.constant 0 : i32
    %c0_i32_1 = arith.constant 0 : i32
    return %c0_i32, %c0_i32_0 : i32, i32
  }
  func.func @transform_11(%arg0: i32) -> (i32, i32) {
    %c0_i32 = arith.constant 0 : i32
    %c0_i32_0 = arith.constant 0 : i32
    %c0_i32_1 = arith.constant 0 : i32
    return %c0_i32, %c0_i32_0 : i32, i32
  }
  func.func @transform_12(%arg0: i32) -> (i32, i32) {
    %c0_i32 = arith.constant 0 : i32
    %c0_i32_0 = arith.constant 0 : i32
    %c0_i32_1 = arith.constant 0 : i32
    return %c0_i32, %c0_i32_0 : i32, i32
  }
  func.func @transform_13(%arg0: i32) -> (i32, i32) {
    %c0_i32 = arith.constant 0 : i32
    %c0_i32_0 = arith.constant 0 : i32
    %c0_i32_1 = arith.constant 0 : i32
    return %c0_i32, %c0_i32_0 : i32, i32
  }
  func.func @transform_14(%arg0: i32) -> (i32, i32, i32) {
    %c0_i32 = arith.constant 0 : i32
    %c0_i32_0 = arith.constant 0 : i32
    %c0_i32_1 = arith.constant 0 : i32
    return %arg0, %c0_i32, %c0_i32_0 : i32, i32, i32
  }
}

</mosaic_0001>

<bundles_post_ra>
// kernel: text_embedding_forward.3
= control target key start
LH: loop header
LB: loop body
LE: loop exit
PB: predicated region body
PF: predicated region fallthrough
CT: control target
= control target key end

     0   :  { %s448_s0 = inlined_call_operand.vmem [shape: s32[2,8], index: 0, kind: input, shape index: {}]   ;;  %s449_s1 = inlined_call_operand.vmem [shape: f32[100,32], index: 1, kind: input, shape index: {}]   ;;  %s450_s2 = inlined_call_operand.vmem [shape: f32[16,32], index: 2, kind: input, shape index: {}]   ;;  %s451_s3 = inlined_call_operand.vmem [shape: f32[1,32], index: 3, kind: input, shape index: {}]   ;;  %s452_s4 = inlined_call_operand.vmem [shape: f32[1,32], index: 4, kind: input, shape index: {}]   ;;  %s453_s5 = inlined_call_operand.vmem [shape: f32[2,8,32], index: 5, kind: output, shape index: {}]  }
   0x1   :  { %s10_s20 = sshll.u32 %s448_s0, 4  ;;  %s11_s20 = int_to_ptr.vmem [resolvable:$true] %s10_s20 }
   0x2   :  { %s329_s21 = scalar_lea.vmem %s11_s20, 32  ;;  %p334_p1 = scmp.lt.s32.totalorder %s11_s20, %s11_s20 }
   0x3   :  { %p330_p0 = scmp.ne.s32.totalorder %s11_s20, %s329_s21  ;;  %p335_p2 = scmp.lt.s32.totalorder %s329_s21, %s329_s21 }
   0x5   :  { %p336_p3 = por %p335_p2, %p334_p1 }
   0x7   :  { %p337_p4 = pnand %p336_p3, %p330_p0 }
   0x9   :  { %340 = shalt.err (!%p337_p4)  }
   0xa   :  { %s351_s22 = smov [#allocation4]  }
   0xb   :  { %13 = dma.vmem_to_smem %s11_s20, 32, %s351_s22, [#allocation3] }
   0xc   :  { %345 = dma.done.wait [#allocation3], 32 }
   0xd   :  { %346 = vsyncadd [#allocation3], 4294967264 }
   0xe   :  { %15 = sfence }
   0xf   :  { %s385_s23 = smov 0  }
  0x10 LB: > { %s391_s0 = sadd.s32 4294967295, %s349_s23   ;;  %p311_p5 = scmp.ge.s32.totalorder %s349_s23, 1  ;;  %s349_s23 = sphi %s385_s23, %s21_s23  }
  0x11   : > { %p159_p6 = scmp.lt.s32.totalorder %s349_s23, 3 }
  0x13   : > { %p160_p7 = pnand %p311_p5, %p159_p6 }
  0x14   : > { %s313_s24 = sshll.u32 (!%p160_p7), %s391_s0, 7  ;;  %vm187_vm0 = vcmask (!%p160_p7), 253952   ;;  %v225_v8 = vld [vmem:[%s450_s2] sm:$0xff] (!%p160_p7)  ;;  %vm229_vm1 = vcmask (!%p160_p7), 261120   ;;  %p179_p8 = scmp.lt.s32.totalorder (!%p160_p7), %s391_s0, 1 }
  0x15   : > { %163 = sbr.rel (%p160_p7) target bundleno = 361 (0x169), region = 36  ;;  %s184_s25 = sld [smem:[#allocation4 + %s313_s24]] (!%p160_p7)  ;;  %v314_v21 = vld [vmem:[%s451_s3] ss:$0 sm:$0xff] (!%p160_p7) }
  0x16   : > { %s189_s26 = sadd.s32 (!%p160_p7), 1, %s313_s24  ;;  %s194_s28 = sadd.s32 (!%p160_p7), 2, %s313_s24  ;;  %v315_v23 = vld [vmem:[%s452_s4] ss:$0 sm:$0xff] (!%p160_p7) }
  0x17   : > { %s190_s27 = sld [smem:[#allocation4 + %s189_s26]] (!%p160_p7)  ;;  %s199_s30 = sadd.s32 (!%p160_p7), 3, %s313_s24 }
  0x18   : > { %s195_s29 = sld [smem:[#allocation4 + %s194_s28]] (!%p160_p7)  ;;  %s204_s7 = sadd.s32 (!%p160_p7), 4, %s313_s24 }
  0x19   : > { %s200_s6 = sld [smem:[#allocation4 + %s199_s30]] (!%p160_p7)  ;;  %s209_s9 = sadd.s32 (!%p160_p7), 5, %s313_s24 }
  0x1a   : > { %s205_s8 = sld [smem:[#allocation4 + %s204_s7]] (!%p160_p7)  ;;  %s214_s11 = sadd.s32 (!%p160_p7), 6, %s313_s24 }
  0x1b   : > { %s210_s10 = sld [smem:[#allocation4 + %s209_s9]] (!%p160_p7)  ;;  %s185_s14 = scalar_lea.vmem (!%p160_p7), %s449_s1, %s184_s25 }
  0x1c   : > { %s215_s15 = sld [smem:[#allocation4 + %s214_s11]]  ;;  %v186_v0 = vld [vmem:[%s185_s14] sm:$0x1]  ;;  %s219_s19 = sadd.s32 7, %s313_s24 }
  0x1d   : > { %s191_s18 = scalar_lea.vmem %s449_s1, %s190_s27  ;;  %188 = vst.msk [vmem:[#allocation2] sm:$0x1] %vm187_vm0, %v186_v0  ;;  %s220_s26 = sld [smem:[#allocation4 + %s219_s19]] }
  0x1e   : > { %v192_v1 = vld [vmem:[%s191_s18] sm:$0x1]  ;;  %s196_s22 = scalar_lea.vmem %s449_s1, %s195_s29  ;;  %s455_s0 = smov (!%p179_p8, %s391_s0), 1 }
  0x1f   : > { %193 = vst.msk [vmem:[#allocation2 + $0x1] sm:$0x1] %vm187_vm0, %v192_v1  ;;  %v197_v2 = vld [vmem:[%s196_s22] sm:$0x1]  ;;  %s201_s30 = scalar_lea.vmem %s449_s1, %s200_s6  ;;  %s312_s19 = sshll.u32 %s455_s0, 3 }
  0x20   : > { %198 = vst.msk [vmem:[#allocation2 + $0x2] sm:$0x1] %vm187_vm0, %v197_v2  ;;  %v202_v3 = vld [vmem:[%s201_s30] sm:$0x1]  ;;  %s206_s7 = scalar_lea.vmem %s449_s1, %s205_s8  ;;  %s182_s28 = scalar_lea.vmem %s453_s5, %s312_s19 }
  0x21   : > { %203 = vst.msk [vmem:[#allocation2 + $0x3] sm:$0x1] %vm187_vm0, %v202_v3  ;;  %v207_v4 = vld [vmem:[%s206_s7] sm:$0x1]  ;;  %s211_s11 = scalar_lea.vmem %s449_s1, %s210_s10 }
  0x22   : > { %208 = vst.msk [vmem:[#allocation2 + $0x4] sm:$0x1] %vm187_vm0, %v207_v4  ;;  %v212_v5 = vld [vmem:[%s211_s11] sm:$0x1]  ;;  %s216_s6 = scalar_lea.vmem %s449_s1, %s215_s15 }
  0x23   : > { %213 = vst.msk [vmem:[#allocation2 + $0x5] sm:$0x1] %vm187_vm0, %v212_v5  ;;  %v217_v6 = vld [vmem:[%s216_s6] sm:$0x1]  ;;  %s221_s16 = scalar_lea.vmem %s449_s1, %s220_s26 }
  0x24   : > { %218 = vst.msk [vmem:[#allocation2 + $0x6] sm:$0x1] %vm187_vm0, %v217_v6  ;;  %v222_v7 = vld [vmem:[%s221_s16] sm:$0x1] }
  0x25   : > { %223 = vst.msk [vmem:[#allocation2 + $0x7] sm:$0x1] %vm187_vm0, %v222_v7 }
  0x2c   : > { %v224_v9 = vld [vmem:[#allocation2] sm:$0xff] }
  0x2d   : > { %v226_v10 = vadd.f32 %v225_v8, %v224_v9 }
  0x2f   : > { %v230_v11 = vsel %vm229_vm1, %v226_v10, 0.0 }
  0x30   : > { %231 = vadd.xlane.f32.xlu0 %v230_v11 }
  0xbd   : > { %v232_v12 = vpop.xlane.xlu0 %231 }
  0xbe   : > { %v234_v13 = vmul.f32 0.03125, %v232_v12 }
  0xc0   : > { %v235_v14 = vsub.f32 %v226_v10, %v234_v13 }
  0xc2   : > { %v236_v15 = vmul.f32 %v235_v14, %v235_v14 }
  0xc4   : > { %v237_v16 = vsel %vm229_vm1, %v236_v15, 0.0 }
  0xc5   : > { %238 = vadd.xlane.f32.xlu0 %v237_v16 }
 0x152   : > { %v239_v17 = vpop.xlane.xlu0 %238 }
 0x153   : > { %v240_v18 = vmul.f32 0.03125, %v239_v17 }
 0x155   : > { %v241_v19 = vadd.f32 1e-05, %v240_v18 }
 0x157   : > { %327 = vrsqrt.f32 %v241_v19 }
 0x161   : > { %v328_v20 = vpop.eup %327 }
 0x162   : > { %v243_v22 = vmul.f32 %v328_v20, %v235_v14 }
 0x164   : > { %v250_v24 = vmul.f32 %v314_v21, %v243_v22 }
 0x166   : > { %v257_v25 = vadd.f32 %v315_v23, %v250_v24 }
 0x168   : > { %258 = vst.msk [vmem:[%s182_s28] sm:$0xff] %vm229_vm1, %v257_v25 }
 0x169 PF: > { %s21_s23 = sadd.s32 1, %s349_s23  }
 0x16a   : > { %p18_p9 = scmp.ge.s32.totalorder %s21_s23, 4  }
 0x16c   :  { %20 = sbr.rel (!%p18_p9) target bundleno = 16 (0x10), region = 71 }

// kernel: text_embedding_forward.4
= control target key start
LH: loop header
LB: loop body
LE: loop exit
PB: predicated region body
PF: predicated region fallthrough
CT: control target
= control target key end

     0   :  { %s2034_s29 = smov 0   ;;  %s2235_s0 = inlined_call_operand.vmem [shape: f32[2,8,32], index: 0, kind: input, shape index: {}]   ;;  %s2236_s1 = inlined_call_operand.vmem [shape: f32[2,1,8], index: 1, kind: input, shape index: {}]   ;;  %s2237_s2 = inlined_call_operand.vmem [shape: bf16[32,96], index: 2, kind: input, shape index: {}]   ;;  %s2238_s3 = inlined_call_operand.vmem [shape: f32[1,96], index: 3, kind: input, shape index: {}]   ;;  %s2239_s4 = inlined_call_operand.vmem [shape: bf16[4,8,32], index: 4, kind: input, shape index: {}]   ;;  %s2240_s5 = inlined_call_operand.vmem [shape: f32[1,32], index: 5, kind: input, shape index: {}]   ;;  %s2241_s6 = inlined_call_operand.vmem [shape: f32[1,32], index: 6, kind: input, shape index: {}]   ;;  %s2242_s7 = inlined_call_operand.vmem [shape: f32[1,32], index: 7, kind: input, shape index: {}]   ;;  %s2243_s8 = inlined_call_operand.vmem [shape: bf16[32,64], index: 8, kind: input, shape index: {}]   ;;  %s2244_s9 = inlined_call_operand.vmem [shape: f32[1,64], index: 9, kind: input, shape index: {}]   ;;  %s2245_s10 = inlined_call_operand.vmem [shape: bf16[64,32], index: 10, kind: input, shape index: {}]   ;;  %s2246_s11 = inlined_call_operand.vmem [shape: f32[1,32], index: 11, kind: input, shape index: {}]   ;;  %s2247_s12 = inlined_call_operand.vmem [shape: f32[1,32], index: 12, kind: input, shape index: {}]   ;;  %s2248_s13 = inlined_call_operand.vmem [shape: f32[1,32], index: 13, kind: input, shape index: {}]   ;;  %s2249_s14 = inlined_call_operand.vmem [shape: f32[2,8,32], index: 14, kind: output, shape index: {}]  }
   0x1 LB: > { %s1712_s30 = sadd.s32 4294967295, %s1944_s29   ;;  %p1716_p0 = scmp.ge.s32.totalorder %s1944_s29, 1  ;;  %s1944_s29 = sphi %s2034_s29, %s24_s29  }
   0x2   : > { %p419_p1 = scmp.lt.s32.totalorder %s1944_s29, 3 }
   0x4   : > { %p420_p2 = pnand %p1716_p0, %p419_p1 }
   0x5   : > { %v1908_v0 = vld [vmem:[%s2237_s2] sm:$0xff] (!%p420_p2)   ;;  %v1946_v1 = vmov (!%p420_p2), 0.0   ;;  %v1909_v2 = vld [vmem:[%s2237_s2 + $0x8] sm:$0xff] (!%p420_p2)   ;;  %vm1947_vm0 = vmmov (!%p420_p2), 0   ;;  %p466_p3 = scmp.lt.s32.totalorder (!%p420_p2), %s1712_s30, 1  ;;  %vm504_vm1 = vcmask (!%p420_p2), 261120  }
   0x6   : > { %423 = sbr.rel (%p420_p2) target bundleno = 4221 (0x107d), region = 76  ;;  %1795 = vmatprep.subr.bf16.mxu0 (!%p420_p2), %v1946_v1  ;;  %1808 = vmatprep.subr.mxu1 (!%p420_p2), %v1946_v1  ;;  %v1719_v5 = vld [vmem:[%s2238_s3] ss:$0 sm:$0xff] (!%p420_p2)  ;;  %s1948_s25 = smov (!%p420_p2), 64   ;;  %vm551_vm2 = vcmask (!%p420_p2), 64512   ;;  %vm896_vm3 = vcmask (!%p420_p2), 1043456  }
   0x7   : > { %1796 = vmatpush3.bf16.msra.mxu0 (!%p420_p2), %v1908_v0  ;;  %1799 = vmatprep.mubr.msk.bf16.mxu0 (!%p420_p2), %vm1947_vm0, %v1946_v1  ;;  %s1949_s26 = smov (!%p420_p2), 96   ;;  %s1950_s27 = smov (!%p420_p2), 88   ;;  %v1730_v41 = vld [vmem:[%s2239_s4 + $0x4] sm:$0xf] (!%p420_p2)  ;;  %v722_v45 = vld [vmem:[%s2239_s4] sm:$0xf] (!%p420_p2) }
   0x8   : > { %1797 = vmatprep.subr.bf16.mxu0 (!%p420_p2), %v1946_v1  ;;  %1810 = vmatprep.mubr.msk.f32.mxu1 (!%p420_p2), %vm1947_vm0, %v1946_v1  ;;  %s1951_s17 = smov (!%p420_p2), 120   ;;  %s1952_s18 = smov (!%p420_p2), 56   ;;  %v898_v42 = vsel (!%p420_p2), %vm896_vm3, %v1730_v41, 0  ;;  %v944_v48 = vsel (!%p420_p2), %vm896_vm3, %v722_v45, 0  ;;  %vm1575_vm4 = vcmask (!%p420_p2), 523264  }
   0x9   : > { %s1953_s20 = smov (!%p420_p2), 80   ;;  %s1954_s21 = smov (!%p420_p2), 112  }
   0xa   : > { %s1957_s28 = smov (!%p420_p2), 104  }
   0xb   : > { %1798 = vmatpush3.bf16.msra.mxu0 (!%p420_p2), %v1909_v2 }
   0xc   : > { %1803 = vmatprep.subr.mxu0 (!%p420_p2), %v1946_v1 }
   0xd   : > { %s2251_s30 = smov (!%p466_p3, %s1712_s30), 1 }
   0xe   : > { %s1717_s19 = sshll.u32 %s2251_s30, 3  ;;  %s472_s16 = scalar_lea.vmem %s2236_s1, %s2251_s30 }
   0xf   : > { %s469_s22 = scalar_lea.vmem %s2235_s0, %s1717_s19  ;;  %v2090_v14 = vld [vmem:[%s472_s16] ss:$0 sm:$0xff]  ;;  %s476_s23 = scalar_lea.vmem %s2249_s14, %s1717_s19 }
  0x10   : > { %v2064_v3 = vld [vmem:[%s469_s22] sm:$0xff] }
  0x11   : > { %v480_v4 = vpack.c.bf16 %v2064_v3, %v2064_v3 }
  0x13   : > { %1800 = vmatmul.mubr.msk.bf16.vlgmr.msra.gmra.mrb[0].mxu0 %vm504_vm1, %v480_v4 }
  0x14   : > { %1805 = vmatprep.mubr.msk.f32.mxu0 %vm1947_vm0, %v1946_v1 }
  0xe6   : > { %v542_v6 = vpop.f32.mrb[0].mxu0 }
  0xe7   : > { %v2074_v7 = vadd.f32 %v1719_v5, %v542_v6  ;;  %v1801_v8 = vpop.f32.mrb[1].mxu0 }
  0xe8   : > { %v545_v9 = vpop.f32.mrb[2].mxu0 }
  0xe9   : > { %645 = vrot.lane.b32.xlu1 %v2074_v7, %s1948_s25  ;;  %549 = vrot.lane.b32.xlu0 %v2074_v7, %s1949_s26  ;;  %v1802_v10 = vpop.f32.mrb[3].mxu0  ;;  %s1955_s26 = smov 48  }
  0xed   : > { %725 = vrot.lane.b32.xlu1 %v2074_v7, %s1950_s27  ;;  %s1956_s27 = smov 72  }
 0x15b   : > { %v646_v11 = vpop.permute.xlu1 %645  ;;  %v550_v12 = vpop.permute.xlu0 %549 }
 0x15c   : > { %1804 = vmatpush3.xpose.msk.msra.mxu0 %vm551_vm2, %v550_v12  ;;  %1809 = vmatpush3.msra.mxu1 %v646_v11 }
 0x15d   : > { %1813 = vmatprep.subr.mxu1 %v1946_v1  ;;  %1818 = vmatprep.subr.mxu0 %v1946_v1 }
 0x15f   : > { %1806 = vmatmul.mubr.msk.f32.vlgmr.msra.gmra.mrb[4].mxu0 %vm551_vm2, %v2074_v7  ;;  %v726_v24 = vpop.permute.xlu1 %725 }
 0x160   : > { %1820 = vmatprep.mubr.msk.f32.mxu0 %vm1947_vm0, %v1946_v1 }
 0x232   : > { %v622_v13 = vpop.f32.mrb[4].mxu0 }
 0x233   : > { %v626_v15 = vmul.f32 0.35355338, %v622_v13  ;;  %v1807_v16 = vpop.f32.mrb[5].mxu0 }
 0x235   : > { %v633_v17 = vadd.f32 %v2090_v14, %v626_v15 }
 0x237   : > { %v634_v18 = vsel %vm551_vm2, %v633_v17, -inf }
 0x238   : > { %635 = vmax.xlane.f32.xlu0 %v634_v18 }
 0x2c5   : > { %v636_v19 = vpop.xlane.xlu0 %635 }
 0x2c6   : > { %v637_v20 = vsub.f32 %v633_v17, %v636_v19 }
 0x2c8   : > { %v638_v21 = vmul.f32 1.442695, %v637_v20  ;;  %v1736_v20 = vld [vmem:[%s2239_s4 + $0x8] sm:$0xf] }
 0x2ca   : > { %1916 = vpow2.f32 %v638_v21  ;;  %v1160_v21 = vsel %vm896_vm3, %v1736_v20, 0 }
 0x2d4   : > { %v1917_v22 = vpop.eup %1916 }
 0x2d5   : > { %v640_v23 = vsel %vm551_vm2, %v1917_v22, 0.0 }
 0x2d6   : > { %641 = vadd.xlane.f32.xlu1 %v640_v23 }
 0x2e7   : > { %723 = vrot.lane.b32.xlu1 %v2074_v7, %s1951_s17  ;;  %s1958_s17 = smov 40  }
 0x363   : > { %v642_v25 = vpop.xlane.xlu1 %641 }
 0x364   : > { %1918 = vrcp.f32 %v642_v25 }
 0x367   : > { %v724_v28 = vpop.permute.xlu1 %723 }
 0x36e   : > { %v1919_v26 = vpop.eup %1918 }
 0x36f   : > { %v644_v27 = vmul.f32 %v1919_v26, %v1917_v22 }
 0x371   : > { %1811 = vmatmul.mubr.msk.f32.vlgmr.msra.gmra.mrb[0].mxu1 %vm551_vm2, %v644_v27 }
 0x372   : > { %1814 = vmatpush3.xpose.msk.msra.mxu1 %vm551_vm2, %v726_v24  ;;  %1815 = vmatprep.mubr.msk.f32.mxu1 %vm1947_vm0, %v1946_v1 }
 0x373   : > { %1823 = vmatprep.subr.bf16.mxu1 %v1946_v1 }
 0x375   : > { %1816 = vmatmul.mubr.msk.f32.vlgmr.msra.gmra.mrb[2].mxu1 %vm551_vm2, %v724_v28 }
 0x376   : > { %1825 = vmatprep.mubr.msk.bf16.mxu1 %vm1947_vm0, %v1946_v1  ;;  %1824 = vmatpush3.bf16.msra.mxu1 %v898_v42 }
 0x377   : > { %1835 = vmatprep.subr.mxu1 %v1946_v1 }
 0x444   : > { %v717_v29 = vpop.f32.mrb[0].mxu1 }
 0x445   : > { %v1812_v30 = vpop.f32.mrb[1].mxu1  ;;  %v721_v49 = vpack.c.bf16 %v717_v29, %v717_v29 }
 0x448   : > { %v797_v31 = vpop.f32.mrb[2].mxu1 }
 0x449   : > { %v801_v32 = vmul.f32 0.35355338, %v797_v31  ;;  %v1817_v33 = vpop.f32.mrb[3].mxu1 }
 0x44b   : > { %v802_v34 = vadd.f32 %v2090_v14, %v801_v32 }
 0x44d   : > { %v803_v35 = vsel %vm551_vm2, %v802_v34, -inf }
 0x44e   : > { %804 = vmax.xlane.f32.xlu1 %v803_v35 }
 0x4db   : > { %v805_v36 = vpop.xlane.xlu1 %804 }
 0x4dc   : > { %v806_v37 = vsub.f32 %v802_v34, %v805_v36 }
 0x4de   : > { %v807_v38 = vmul.f32 1.442695, %v806_v37 }
 0x4e0   : > { %1920 = vpow2.f32 %v807_v38 }
 0x4ea   : > { %v1921_v39 = vpop.eup %1920 }
 0x4eb   : > { %v809_v40 = vsel %vm551_vm2, %v1921_v39, 0.0 }
 0x4ec   : > { %810 = vadd.xlane.f32.xlu0 %v809_v40 }
 0x502   : > { %814 = vrot.lane.b32.xlu0 %v2074_v7, %s1952_s18 }
 0x506   : > { %988 = vrot.lane.b32.xlu0 %v2074_v7, %s1953_s20 }
 0x50a   : > { %986 = vrot.lane.b32.xlu0 %v2074_v7, %s1954_s21 }
 0x579   : > { %v811_v43 = vpop.xlane.xlu0 %810 }
 0x57a   : > { %1922 = vrcp.f32 %v811_v43 }
 0x57d   : > { %v815_v44 = vpop.permute.xlu0 %814 }
 0x57e   : > { %1819 = vmatpush3.msra.mxu0 %v815_v44 }
 0x57f   : > { %1829 = vmatprep.subr.bf16.mxu0 %v1946_v1 }
 0x581   : > { %v989_v53 = vpop.permute.xlu0 %988 }
 0x584   : > { %v1923_v46 = vpop.eup %1922 }
 0x585   : > { %v813_v47 = vmul.f32 %v1923_v46, %v1921_v39  ;;  %v987_v58 = vpop.permute.xlu0 %986 }
 0x587   : > { %1821 = vmatmul.mubr.msk.f32.vlgmr.msra.gmra.mrb[6].mxu0 %vm551_vm2, %v813_v47 }
 0x588   : > { %1830 = vmatpush3.bf16.msra.mxu0 %v944_v48  ;;  %1831 = vmatprep.mubr.msk.bf16.mxu0 %vm1947_vm0, %v1946_v1  ;;  %v1743_v48 = vld [vmem:[%s2240_s5] ss:$0 sm:$0xff] }
 0x589   : > { %1840 = vmatprep.subr.mxu0 %v1946_v1 }
 0x58b   : > { %1832 = vmatmul.mubr.msk.bf16.vlgmr.msra.gmra.mrb[8].mxu0 %vm551_vm2, %v721_v49 }
 0x58c   : > { %1842 = vmatprep.mubr.msk.f32.mxu0 %vm1947_vm0, %v1946_v1 }
 0x65a   : > { %v886_v50 = vpop.f32.mrb[6].mxu0 }
 0x65b   : > { %v890_v51 = vpack.c.bf16 %v886_v50, %v886_v50  ;;  %v1822_v52 = vpop.f32.mrb[7].mxu0 }
 0x65d   : > { %1826 = vmatmul.mubr.msk.bf16.vlgmr.msra.gmra.mrb[4].mxu1 %vm551_vm2, %v890_v51 }
 0x65e   : > { %1836 = vmatpush3.xpose.msk.msra.mxu1 %vm551_vm2, %v989_v53  ;;  %v980_v54 = vpop.f32.mrb[8].mxu0  ;;  %1837 = vmatprep.mubr.msk.f32.mxu1 %vm1947_vm0, %v1946_v1 }
 0x65f   : > { %v1833_v55 = vpop.f32.mrb[9].mxu0  ;;  %1845 = vmatprep.subr.bf16.mxu1 %v1946_v1 }
 0x660   : > { %v983_v56 = vpop.f32.mrb[10].mxu0 }
 0x661   : > { %v1834_v57 = vpop.f32.mrb[11].mxu0 }
 0x665   : > { %1838 = vmatmul.mubr.msk.f32.vlgmr.msra.gmra.mrb[8].mxu1 %vm551_vm2, %v987_v58 }
 0x666   : > { %1847 = vmatprep.mubr.msk.bf16.mxu1 %vm1947_vm0, %v1946_v1  ;;  %1846 = vmatpush3.bf16.msra.mxu1 %v1160_v21 }
 0x667   : > { %1861 = vmatprep.subr.bf16.mxu1 %v1946_v1 }
 0x730   : > { %v934_v59 = vpop.f32.mrb[4].mxu1 }
 0x731   : > { %v2135_v60 = vadd.f32 %v980_v54, %v934_v59  ;;  %v1827_v61 = vpop.f32.mrb[5].mxu1 }
 0x732   : > { %v937_v62 = vpop.f32.mrb[6].mxu1  ;;  %v1910_v61 = vld [vmem:[%s2243_s8] sm:$0xff]  }
 0x733   : > { %v1828_v63 = vpop.f32.mrb[7].mxu1  ;;  %v1911_v62 = vld [vmem:[%s2243_s8 + $0x8] sm:$0xff]  }
 0x738   : > { %v1060_v0 = vpop.f32.mrb[8].mxu1 }
 0x739   : > { %v1064_v2 = vmul.f32 0.35355338, %v1060_v0  ;;  %v1839_v4 = vpop.f32.mrb[9].mxu1 }
 0x73a   : > { %v1744_v4 = vld [vmem:[%s2241_s6] ss:$0 sm:$0xff] }
 0x73b   : > { %v1065_v5 = vadd.f32 %v2090_v14, %v1064_v2 }
 0x73d   : > { %v1066_v6 = vsel %vm551_vm2, %v1065_v5, -inf }
 0x73e   : > { %1067 = vmax.xlane.f32.xlu1 %v1066_v6  ;;  %v1745_v6 = vld [vmem:[%s2242_s7] ss:$0 sm:$0xff] }
 0x74f   : > { %1077 = vrot.lane.b32.xlu1 %v2074_v7, %s1955_s26 }
 0x753   : > { %1205 = vrot.lane.b32.xlu1 %v2074_v7, %s1956_s27 }
 0x757   : > { %1203 = vrot.lane.b32.xlu1 %v2074_v7, %s1957_s28 }
 0x7cb   : > { %v1068_v8 = vpop.xlane.xlu1 %1067 }
 0x7cc   : > { %v1069_v9 = vsub.f32 %v1065_v5, %v1068_v8 }
 0x7ce   : > { %v1070_v10 = vmul.f32 1.442695, %v1069_v9 }
 0x7cf   : > { %v1078_v11 = vpop.permute.xlu1 %1077 }
 0x7d0   : > { %1924 = vpow2.f32 %v1070_v10  ;;  %1841 = vmatpush3.msra.mxu0 %v1078_v11  ;;  %v1912_v11 = vld [vmem:[%s2245_s10] sm:$0xff]  }
 0x7d1   : > { %1851 = vmatprep.subr.mxu0 %v1946_v1 }
 0x7d3   : > { %v1206_v17 = vpop.permute.xlu1 %1205 }
 0x7d7   : > { %v1204_v19 = vpop.permute.xlu1 %1203 }
 0x7da   : > { %v1925_v12 = vpop.eup %1924 }
 0x7db   : > { %v1072_v13 = vsel %vm551_vm2, %v1925_v12, 0.0 }
 0x7dc   : > { %1073 = vadd.xlane.f32.xlu0 %v1072_v13  ;;  %v1914_v13 = vld [vmem:[%s2245_s10 + $0x10] sm:$0xff]  }
 0x869   : > { %v1074_v15 = vpop.xlane.xlu0 %1073 }
 0x86a   : > { %1926 = vrcp.f32 %v1074_v15  ;;  %v1915_v15 = vld [vmem:[%s2245_s10 + $0x18] sm:$0xff]  }
 0x874   : > { %v1927_v16 = vpop.eup %1926 }
 0x875   : > { %v1076_v18 = vmul.f32 %v1927_v16, %v1925_v12  ;;  %v1913_v12 = vld [vmem:[%s2245_s10 + $0x8] sm:$0xff]   ;;  %v1746_v16 = vld [vmem:[%s2244_s9] ss:$0 sm:$0xff] }
 0x877   : > { %1843 = vmatmul.mubr.msk.f32.vlgmr.msra.gmra.mrb[12].mxu0 %vm551_vm2, %v1076_v18 }
 0x878   : > { %1852 = vmatpush3.xpose.msk.msra.mxu0 %vm551_vm2, %v1206_v17  ;;  %1853 = vmatprep.mubr.msk.f32.mxu0 %vm1947_vm0, %v1946_v1 }
 0x879   : > { %1856 = vmatprep.subr.mxu0 %v1946_v1 }
 0x87b   : > { %1854 = vmatmul.mubr.msk.f32.vlgmr.msra.gmra.mrb[14].mxu0 %vm551_vm2, %v1204_v19 }
 0x87c   : > { %1858 = vmatprep.mubr.msk.f32.mxu0 %vm1947_vm0, %v1946_v1 }
 0x94a   : > { %v1149_v22 = vpop.f32.mrb[12].mxu0 }
 0x94b   : > { %v1153_v23 = vpack.c.bf16 %v1149_v22, %v1149_v22  ;;  %v1844_v24 = vpop.f32.mrb[13].mxu0 }
 0x94d   : > { %1848 = vmatmul.mubr.msk.bf16.vlgmr.msra.gmra.mrb[12].mxu1 %vm551_vm2, %v1153_v23 }
 0x94e   : > { %v1277_v25 = vpop.f32.mrb[14].mxu0  ;;  %1863 = vmatprep.mubr.msk.bf16.mxu1 %vm1947_vm0, %v1946_v1 }
 0x94f   : > { %v1281_v26 = vmul.f32 0.35355338, %v1277_v25  ;;  %v1855_v27 = vpop.f32.mrb[15].mxu0 }
 0x951   : > { %v1282_v28 = vadd.f32 %v2090_v14, %v1281_v26 }
 0x953   : > { %v1283_v29 = vsel %vm551_vm2, %v1282_v28, -inf }
 0x954   : > { %1284 = vmax.xlane.f32.xlu1 %v1283_v29 }
 0x9e1   : > { %v1285_v30 = vpop.xlane.xlu1 %1284 }
 0x9e2   : > { %v1286_v31 = vsub.f32 %v1282_v28, %v1285_v30 }
 0x9e4   : > { %v1287_v32 = vmul.f32 1.442695, %v1286_v31  ;;  %v1750_v31 = vld [vmem:[%s2246_s11] ss:$0 sm:$0xff] }
 0x9e6   : > { %1928 = vpow2.f32 %v1287_v32 }
 0x9f0   : > { %v1929_v33 = vpop.eup %1928 }
 0x9f1   : > { %v1289_v34 = vsel %vm551_vm2, %v1929_v33, 0.0 }
 0x9f2   : > { %1290 = vadd.xlane.f32.xlu0 %v1289_v34 }
 0xa08   : > { %1294 = vrot.lane.b32.xlu0 %v2074_v7, %s1958_s17  ;;  %v1741_v7 = vld [vmem:[%s2239_s4 + $0xc] sm:$0xf] }
 0xa09   : > { %v1377_v43 = vsel %vm896_vm3, %v1741_v7, 0 }
 0xa0a   : > { %1862 = vmatpush3.bf16.msra.mxu1 %v1377_v43 }
 0xa0b   : > { %1875 = vmatprep.subr.bf16.mxu1 %v1946_v1 }
 0xa20   : > { %v1196_v35 = vpop.f32.mrb[12].mxu1 }
 0xa21   : > { %v1202_v36 = vadd.f32 %v1196_v35, %v2135_v60  ;;  %v1849_v37 = vpop.f32.mrb[13].mxu1 }
 0xa22   : > { %v1199_v38 = vpop.f32.mrb[14].mxu1 }
 0xa23   : > { %v1850_v14 = vpop.f32.mrb[15].mxu1 }
 0xa7f   : > { %v1291_v39 = vpop.xlane.xlu0 %1290 }
 0xa80   : > { %1930 = vrcp.f32 %v1291_v39 }
 0xa83   : > { %v1295_v40 = vpop.permute.xlu0 %1294 }
 0xa84   : > { %1857 = vmatpush3.msra.mxu0 %v1295_v40 }
 0xa85   : > { %1867 = vmatprep.subr.bf16.mxu0 %v1946_v1 }
 0xa8a   : > { %v1931_v41 = vpop.eup %1930 }
 0xa8b   : > { %v1293_v42 = vmul.f32 %v1931_v41, %v1929_v33 }
 0xa8d   : > { %1859 = vmatmul.mubr.msk.f32.vlgmr.msra.gmra.mrb[16].mxu0 %vm551_vm2, %v1293_v42 }
 0xa8e   : > { %1871 = vmatprep.mubr.msk.bf16.mxu0 %vm1947_vm0, %v1946_v1  ;;  %1868 = vmatpush3.bf16.msra.mxu0 %v1910_v61 }
 0xa8f   : > { %1869 = vmatprep.subr.bf16.mxu0 %v1946_v1 }
 0xa92   : > { %1870 = vmatpush3.bf16.msra.mxu0 %v1911_v62 }
 0xb60   : > { %v1366_v44 = vpop.f32.mrb[16].mxu0 }
 0xb61   : > { %v1370_v45 = vpack.c.bf16 %v1366_v44, %v1366_v44  ;;  %v1860_v46 = vpop.f32.mrb[17].mxu0 }
 0xb62   : > { %v1756_v46 = vld [vmem:[%s2247_s12] ss:$0 sm:$0xff] }
 0xb63   : > { %1864 = vmatmul.mubr.msk.bf16.vlgmr.msra.gmra.mrb[16].mxu1 %vm551_vm2, %v1370_v45 }
 0xb64   : > { %1883 = vmatprep.mubr.msk.bf16.mxu1 %vm1947_vm0, %v1946_v1  ;;  %1876 = vmatpush3.bf16.msra.mxu1 %v1912_v11 }
 0xb65   : > { %1877 = vmatprep.subr.bf16.mxu1 %v1946_v1 }
 0xb68   : > { %1878 = vmatpush3.bf16.msra.mxu1 %v1913_v12 }
 0xb69   : > { %1879 = vmatprep.subr.bf16.mxu1 %v1946_v1 }
 0xb6c   : > { %1880 = vmatpush3.bf16.msra.mxu1 %v1914_v13 }
 0xb6d   : > { %1881 = vmatprep.subr.bf16.mxu1 %v1946_v1 }
 0xb70   : > { %1882 = vmatpush3.bf16.msra.mxu1 %v1915_v15 }
 0xc36   : > { %v1413_v47 = vpop.f32.mrb[16].mxu1 }
 0xc37   : > { %v1419_v49 = vadd.f32 %v1413_v47, %v1202_v36  ;;  %v1865_v50 = vpop.f32.mrb[17].mxu1 }
 0xc38   : > { %v1416_v51 = vpop.f32.mrb[18].mxu1 }
 0xc39   : > { %v1427_v52 = vadd.f32 %v1743_v48, %v1419_v49  ;;  %v1866_v53 = vpop.f32.mrb[19].mxu1  ;;  %v1757_v48 = vld [vmem:[%s2248_s13] ss:$0 sm:$0xff] }
 0xc3b   : > { %v1428_v54 = vadd.f32 %v1427_v52, %v2064_v3 }
 0xc3d   : > { %v1431_v55 = vsel %vm504_vm1, %v1428_v54, 0.0 }
 0xc3e   : > { %1432 = vadd.xlane.f32.xlu0 %v1431_v55 }
 0xccb   : > { %v1433_v56 = vpop.xlane.xlu0 %1432 }
 0xccc   : > { %v1435_v57 = vmul.f32 0.03125, %v1433_v56 }
 0xcce   : > { %v1436_v58 = vsub.f32 %v1428_v54, %v1435_v57 }
 0xcd0   : > { %v1437_v59 = vmul.f32 %v1436_v58, %v1436_v58 }
 0xcd2   : > { %v1438_v60 = vsel %vm504_vm1, %v1437_v59, 0.0 }
 0xcd3   : > { %1439 = vadd.xlane.f32.xlu1 %v1438_v60 }
 0xd60   : > { %v1440_v3 = vpop.xlane.xlu1 %1439 }
 0xd61   : > { %v1441_v63 = vmul.f32 0.03125, %v1440_v3 }
 0xd63   : > { %v1442_v0 = vadd.f32 1e-05, %v1441_v63 }
 0xd65   : > { %1932 = vrsqrt.f32 %v1442_v0 }
 0xd6f   : > { %v1933_v2 = vpop.eup %1932 }
 0xd70   : > { %v1444_v5 = vmul.f32 %v1933_v2, %v1436_v58 }
 0xd72   : > { %v1451_v8 = vmul.f32 %v1744_v4, %v1444_v5 }
 0xd74   : > { %v1458_v9 = vadd.f32 %v1745_v6, %v1451_v8 }
 0xd76   : > { %v1459_v10 = vpack.c.bf16 %v1458_v9, %v1458_v9 }
 0xd78   : > { %1872 = vmatmul.mubr.msk.bf16.vlgmr.msra.gmra.mrb[20].mxu0 %vm504_vm1, %v1459_v10 }
 0xe4b   : > { %v1520_v17 = vpop.f32.mrb[20].mxu0 }
 0xe4c   : > { %v1521_v18 = vadd.f32 %v1746_v16, %v1520_v17  ;;  %v1873_v19 = vpop.f32.mrb[21].mxu0 }
 0xe4d   : > { %v1523_v20 = vpop.f32.mrb[22].mxu0 }
 0xe4e   : > { %v1526_v21 = vmul.f32 %v1521_v18, %v1521_v18  ;;  %v1874_v22 = vpop.f32.mrb[23].mxu0 }
 0xe50   : > { %v1527_v23 = vmul.f32 %v1526_v21, %v1521_v18 }
 0xe52   : > { %v1528_v24 = vmul.f32 0.044715, %v1527_v23 }
 0xe54   : > { %v1529_v25 = vadd.f32 %v1528_v24, %v1521_v18 }
 0xe56   : > { %v1530_v26 = vmul.f32 0.7978846, %v1529_v25 }
 0xe58   : > { %1934 = vtanh.f32 %v1530_v26 }
 0xe62   : > { %v1935_v1 = vpop.eup %1934 }
 0xe63   : > { %v1532_v27 = vadd.f32 1.0, %v1935_v1 }
 0xe65   : > { %v1533_v28 = vmul.f32 0.5, %v1532_v27 }
 0xe67   : > { %v1534_v29 = vmul.f32 %v1533_v28, %v1521_v18 }
 0xe69   : > { %v1535_v30 = vpack.c.bf16 %v1534_v29, %v1534_v29 }
 0xe6b   : > { %1884 = vmatmul.mubr.msk.bf16.vlgmr.msra.gmra.mrb[20].mxu1 %vm1575_vm4, %v1535_v30 }
 0xf3e   : > { %v1613_v32 = vpop.f32.mrb[20].mxu1 }
 0xf3f   : > { %v1614_v33 = vadd.f32 %v1750_v31, %v1613_v32  ;;  %v1885_v34 = vpop.f32.mrb[21].mxu1 }
 0xf40   : > { %v1616_v35 = vpop.f32.mrb[22].mxu1 }
 0xf41   : > { %v1886_v36 = vpop.f32.mrb[23].mxu1  ;;  %v1619_v37 = vadd.f32 %v1614_v33, %v1458_v9 }
 0xf43   : > { %v1622_v38 = vsel %vm504_vm1, %v1619_v37, 0.0 }
 0xf44   : > { %1623 = vadd.xlane.f32.xlu1 %v1622_v38 }
 0xfd1   : > { %v1624_v14 = vpop.xlane.xlu1 %1623 }
 0xfd2   : > { %v1625_v39 = vmul.f32 0.03125, %v1624_v14 }
 0xfd4   : > { %v1626_v40 = vsub.f32 %v1619_v37, %v1625_v39 }
 0xfd6   : > { %v1627_v41 = vmul.f32 %v1626_v40, %v1626_v40 }
 0xfd8   : > { %v1628_v42 = vsel %vm504_vm1, %v1627_v41, 0.0 }
 0xfd9   : > { %1629 = vadd.xlane.f32.xlu1 %v1628_v42 }
0x1066   : > { %v1630_v7 = vpop.xlane.xlu1 %1629 }
0x1067   : > { %v1631_v43 = vmul.f32 0.03125, %v1630_v7 }
0x1069   : > { %v1632_v44 = vadd.f32 1e-05, %v1631_v43 }
0x106b   : > { %1936 = vrsqrt.f32 %v1632_v44 }
0x1075   : > { %v1937_v45 = vpop.eup %1936 }
0x1076   : > { %v1634_v47 = vmul.f32 %v1937_v45, %v1626_v40 }
0x1078   : > { %v1641_v49 = vmul.f32 %v1756_v46, %v1634_v47 }
0x107a   : > { %v1648_v50 = vadd.f32 %v1757_v48, %v1641_v49 }
0x107c   : > { %1649 = vst.msk [vmem:[%s476_s23] sm:$0xff] %vm504_vm1, %v1648_v50 }
0x107d PF: > { %s24_s29 = sadd.s32 1, %s1944_s29  }
0x107e   : > { %p21_p4 = scmp.ge.s32.totalorder %s24_s29, 4  }
0x1080   :  { %23 = sbr.rel (!%p21_p4) target bundleno = 1 (0x1), region = 112 }

// kernel: text_embedding_forward.5
= control target key start
LH: loop header
LB: loop body
LE: loop exit
PB: predicated region body
PF: predicated region fallthrough
CT: control target
= control target key end

     0   :  { %s2423_s0 = inlined_call_operand.vmem [shape: f32[2,8,32], index: 0, kind: input, shape index: {}]   ;;  %s2424_s1 = inlined_call_operand.vmem [shape: f32[2,1,8], index: 1, kind: input, shape index: {}]   ;;  %s2425_s2 = inlined_call_operand.vmem [shape: bf16[32,96], index: 2, kind: input, shape index: {}]   ;;  %s2426_s3 = inlined_call_operand.vmem [shape: f32[1,96], index: 3, kind: input, shape index: {}]   ;;  %s2427_s4 = inlined_call_operand.vmem [shape: bf16[4,8,32], index: 4, kind: input, shape index: {}]   ;;  %s2428_s5 = inlined_call_operand.vmem [shape: f32[1,32], index: 5, kind: input, shape index: {}]   ;;  %s2429_s6 = inlined_call_operand.vmem [shape: f32[1,32], index: 6, kind: input, shape index: {}]   ;;  %s2430_s7 = inlined_call_operand.vmem [shape: f32[1,32], index: 7, kind: input, shape index: {}]   ;;  %s2431_s8 = inlined_call_operand.vmem [shape: bf16[32,64], index: 8, kind: input, shape index: {}]   ;;  %s2432_s9 = inlined_call_operand.vmem [shape: f32[1,64], index: 9, kind: input, shape index: {}]   ;;  %s2433_s10 = inlined_call_operand.vmem [shape: bf16[64,32], index: 10, kind: input, shape index: {}]   ;;  %s2434_s11 = inlined_call_operand.vmem [shape: f32[1,32], index: 11, kind: input, shape index: {}]   ;;  %s2435_s12 = inlined_call_operand.vmem [shape: f32[1,32], index: 12, kind: input, shape index: {}]   ;;  %s2436_s13 = inlined_call_operand.vmem [shape: f32[1,32], index: 13, kind: input, shape index: {}]   ;;  %s2437_s14 = inlined_call_operand.hbm [shape: f32[2,8,32], index: 14, kind: output, shape index: {}]  }
   0x1   :  { %2438 = sst [smem:[#allocation5_spill]] %s2423_s0 }
   0x2   :  { %2439 = sst [smem:[#allocation6_spill]] %s2424_s1 }
   0x3   :  { %2440 = sst [smem:[#allocation7_spill]] %s2425_s2 }
   0x4   :  { %2441 = sst [smem:[#allocation8_spill]] %s2426_s3 }
   0x5   :  { %2442 = sst [smem:[#allocation9_spill]] %s2427_s4 }
   0x6   :  { %19 = vsyncpa [#allocation3], 0 }
   0x7   :  { %21 = vsyncpa [#allocation3 + $0x1], 0  ;;  %s2143_s29 = smov 0   ;;  %s2145_s30 = smov 0  }
   0x8   :  { %s2147_s15 = smov 0   ;;  %s2149_s16 = smov 0  }
   0x9 LB: > { %s2164_s17 = sadd.s32 4294967295, %s2052_s16   ;;  %s1732_s18 = sadd.s32 4294967294, %s2052_s16   ;;  %s2052_s16 = sphi %s2149_s16, %s2453_s16   ;;  %s2048_s15 = sphi %s2147_s15, %s2452_s15   ;;  %s2044_s30 = sphi %s2145_s30, %s2451_s30   ;;  %s2040_s29 = sphi %s2143_s29, %s2450_s29  }
   0xa   : > { %s2168_s19 = sadd.s32 1, %s2052_s16   ;;  %s338_s20 = sadd.s32 1, %s2048_s15 }
   0xb   : > { %s335_s21 = ssub.s32 %s2052_s16, %s2168_s19  ;;  %p348_p0 = scmp.ne.s32.totalorder %s2048_s15, %s2044_s30 }
   0xc   : > { %p336_p1 = scmp.eq.s32.totalorder %s335_s21, 0  ;;  %p349_p2 = scmp.eq.s32.totalorder %s2164_s17, 1 }
   0xd   : > { %p354_p3 = scmp.ne.s32.totalorder %s2044_s30, %s2040_s29  ;;  %p355_p4 = scmp.eq.s32.totalorder %s1732_s18, 1 }
   0xe   : > { %s2179_s22 = scalar_select %p336_p1, %s2048_s15, %s338_s20  }
   0xf   : > { %p2181_p5 = por %p349_p2, %p348_p0  ;;  %p2185_p6 = por %p355_p4, %p354_p3 }
  0x10   : > { %p1735_p7 = scmp.ge.s32.totalorder %s2052_s16, 1  ;;  %p422_p8 = scmp.lt.s32.totalorder %s2052_s16, 3 }
  0x12   : > { %p423_p9 = pnand %p1735_p7, %p422_p8 }
  0x13   : > { %s2445_s2 = sld [smem:[#allocation7_spill]] (!%p423_p9)  ;;  %v2054_v1 = vmov (!%p423_p9), 0.0   ;;  %vm2055_vm0 = vmmov (!%p423_p9), 0   ;;  %p470_p10 = scmp.lt.s32.totalorder (!%p423_p9), %s2164_s17, 1  ;;  %vm504_vm1 = vcmask (!%p423_p9), 261120   ;;  %vm551_vm2 = vcmask (!%p423_p9), 64512  }
  0x14   : > { %426 = sbr.rel (%p423_p9) target bundleno = 4249 (0x1099), region = 76  ;;  %1816 = vmatprep.subr.bf16.mxu0 (!%p423_p9), %v2054_v1  ;;  %1829 = vmatprep.subr.mxu1 (!%p423_p9), %v2054_v1  ;;  %s2446_s0 = sld [smem:[#allocation5_spill]] (!%p423_p9)  ;;  %vm896_vm3 = vcmask (!%p423_p9), 1043456   ;;  %vm1575_vm4 = vcmask (!%p423_p9), 523264  }
  0x15   : > { %1820 = vmatprep.mubr.msk.bf16.mxu0 (!%p423_p9), %vm2055_vm0, %v2054_v1  ;;  %1831 = vmatprep.mubr.msk.f32.mxu1 (!%p423_p9), %vm2055_vm0, %v2054_v1  ;;  %s2447_s3 = sld [smem:[#allocation8_spill]] (!%p423_p9)  ;;  %s2057_s21 = smov (!%p423_p9), 96  }
  0x16   : > { %s2058_s25 = smov (!%p423_p9), 88   ;;  %s2448_s1 = sld [smem:[#allocation6_spill]] (!%p423_p9) }
  0x17   : > { %s2449_s4 = sld [smem:[#allocation9_spill]] (!%p423_p9) }
  0x19   : > { %v1960_v0 = vld [vmem:[%s2445_s2] sm:$0xff] (!%p423_p9)   ;;  %v1961_v2 = vld [vmem:[%s2445_s2 + $0x8] sm:$0xff] (!%p423_p9)  }
  0x1a   : > { %1817 = vmatpush3.bf16.msra.mxu0 (!%p423_p9), %v1960_v0 }
  0x1b   : > { %1818 = vmatprep.subr.bf16.mxu0 %v2054_v1  ;;  %s2206_s18 = scalar_select %p470_p10, %s2164_s17, 1  ;;  %v1738_v5 = vld [vmem:[%s2447_s3] ss:$0 sm:$0xff] }
  0x1d   : > { %s1737_s20 = sshll.u32 %s2206_s18, 3  ;;  %s476_s28 = scalar_lea.vmem %s2448_s1, %s2206_s18  ;;  %v1749_v41 = vld [vmem:[%s2449_s4 + $0x4] sm:$0xf]  ;;  %v722_v45 = vld [vmem:[%s2449_s4] sm:$0xf] }
  0x1e   : > { %1819 = vmatpush3.bf16.msra.mxu0 %v1961_v2  ;;  %s473_s26 = scalar_lea.vmem %s2446_s0, %s1737_s20  ;;  %s2056_s20 = smov 64   ;;  %v2239_v14 = vld [vmem:[%s476_s28] ss:$0 sm:$0xff]  ;;  %v898_v42 = vsel %vm896_vm3, %v1749_v41, 0  ;;  %v944_v48 = vsel %vm896_vm3, %v722_v45, 0 }
  0x1f   : > { %1824 = vmatprep.subr.mxu0 %v2054_v1  ;;  %v2213_v3 = vld [vmem:[%s473_s26] sm:$0xff]  ;;  %s2060_s18 = smov 56   ;;  %s2066_s28 = smov 40  }
  0x20   : > { %v480_v4 = vpack.c.bf16 %v2213_v3, %v2213_v3  ;;  %s1778_s0 = sshll.u32 %s2164_s17, 7  ;;  %s2067_s17 = smov [#allocation2]  }
  0x22   : > { %1821 = vmatmul.mubr.msk.bf16.vlgmr.msra.gmra.mrb[0].mxu0 %vm504_vm1, %v480_v4 }
  0x23   : > { %1826 = vmatprep.mubr.msk.f32.mxu0 %vm2055_vm0, %v2054_v1 }
  0xf5   : > { %v542_v6 = vpop.f32.mrb[0].mxu0 }
  0xf6   : > { %v2223_v7 = vadd.f32 %v1738_v5, %v542_v6  ;;  %v1822_v8 = vpop.f32.mrb[1].mxu0 }
  0xf7   : > { %v545_v9 = vpop.f32.mrb[2].mxu0 }
  0xf8   : > { %645 = vrot.lane.b32.xlu1 %v2223_v7, %s2056_s20  ;;  %549 = vrot.lane.b32.xlu0 %v2223_v7, %s2057_s21  ;;  %v1823_v10 = vpop.f32.mrb[3].mxu0  ;;  %s2059_s20 = smov 120   ;;  %s2061_s21 = smov 80  }
  0xfc   : > { %725 = vrot.lane.b32.xlu1 %v2223_v7, %s2058_s25  ;;  %s2062_s25 = smov 112  }
 0x16a   : > { %v646_v11 = vpop.permute.xlu1 %645  ;;  %v550_v12 = vpop.permute.xlu0 %549 }
 0x16b   : > { %1825 = vmatpush3.xpose.msk.msra.mxu0 %vm551_vm2, %v550_v12  ;;  %1830 = vmatpush3.msra.mxu1 %v646_v11 }
 0x16c   : > { %1834 = vmatprep.subr.mxu1 %v2054_v1  ;;  %1839 = vmatprep.subr.mxu0 %v2054_v1 }
 0x16e   : > { %1827 = vmatmul.mubr.msk.f32.vlgmr.msra.gmra.mrb[4].mxu0 %vm551_vm2, %v2223_v7  ;;  %v726_v24 = vpop.permute.xlu1 %725 }
 0x16f   : > { %1841 = vmatprep.mubr.msk.f32.mxu0 %vm2055_vm0, %v2054_v1 }
 0x241   : > { %v622_v13 = vpop.f32.mrb[4].mxu0 }
 0x242   : > { %v626_v15 = vmul.f32 0.35355338, %v622_v13  ;;  %v1828_v16 = vpop.f32.mrb[5].mxu0 }
 0x244   : > { %v633_v17 = vadd.f32 %v2239_v14, %v626_v15 }
 0x246   : > { %v634_v18 = vsel %vm551_vm2, %v633_v17, -inf }
 0x247   : > { %635 = vmax.xlane.f32.xlu0 %v634_v18 }
 0x2d4   : > { %v636_v19 = vpop.xlane.xlu0 %635 }
 0x2d5   : > { %v637_v20 = vsub.f32 %v633_v17, %v636_v19 }
 0x2d7   : > { %v638_v21 = vmul.f32 1.442695, %v637_v20  ;;  %v1755_v20 = vld [vmem:[%s2449_s4 + $0x8] sm:$0xf] }
 0x2d9   : > { %1968 = vpow2.f32 %v638_v21  ;;  %v1160_v21 = vsel %vm896_vm3, %v1755_v20, 0 }
 0x2e3   : > { %v1969_v22 = vpop.eup %1968 }
 0x2e4   : > { %v640_v23 = vsel %vm551_vm2, %v1969_v22, 0.0 }
 0x2e5   : > { %641 = vadd.xlane.f32.xlu1 %v640_v23 }
 0x2f6   : > { %723 = vrot.lane.b32.xlu1 %v2223_v7, %s2059_s20 }
 0x372   : > { %v642_v25 = vpop.xlane.xlu1 %641 }
 0x373   : > { %1970 = vrcp.f32 %v642_v25 }
 0x376   : > { %v724_v28 = vpop.permute.xlu1 %723 }
 0x37d   : > { %v1971_v26 = vpop.eup %1970 }
 0x37e   : > { %v644_v27 = vmul.f32 %v1971_v26, %v1969_v22 }
 0x380   : > { %1832 = vmatmul.mubr.msk.f32.vlgmr.msra.gmra.mrb[0].mxu1 %vm551_vm2, %v644_v27 }
 0x381   : > { %1835 = vmatpush3.xpose.msk.msra.mxu1 %vm551_vm2, %v726_v24  ;;  %1836 = vmatprep.mubr.msk.f32.mxu1 %vm2055_vm0, %v2054_v1 }
 0x382   : > { %1844 = vmatprep.subr.bf16.mxu1 %v2054_v1 }
 0x384   : > { %1837 = vmatmul.mubr.msk.f32.vlgmr.msra.gmra.mrb[2].mxu1 %vm551_vm2, %v724_v28 }
 0x385   : > { %1846 = vmatprep.mubr.msk.bf16.mxu1 %vm2055_vm0, %v2054_v1  ;;  %1845 = vmatpush3.bf16.msra.mxu1 %v898_v42 }
 0x386   : > { %1856 = vmatprep.subr.mxu1 %v2054_v1 }
 0x453   : > { %v717_v29 = vpop.f32.mrb[0].mxu1 }
 0x454   : > { %v1833_v30 = vpop.f32.mrb[1].mxu1  ;;  %v721_v49 = vpack.c.bf16 %v717_v29, %v717_v29 }
 0x457   : > { %v797_v31 = vpop.f32.mrb[2].mxu1 }
 0x458   : > { %v801_v32 = vmul.f32 0.35355338, %v797_v31  ;;  %v1838_v33 = vpop.f32.mrb[3].mxu1 }
 0x45a   : > { %v802_v34 = vadd.f32 %v2239_v14, %v801_v32 }
 0x45c   : > { %v803_v35 = vsel %vm551_vm2, %v802_v34, -inf }
 0x45d   : > { %804 = vmax.xlane.f32.xlu1 %v803_v35 }
 0x4ea   : > { %v805_v36 = vpop.xlane.xlu1 %804 }
 0x4eb   : > { %v806_v37 = vsub.f32 %v802_v34, %v805_v36 }
 0x4ed   : > { %v807_v38 = vmul.f32 1.442695, %v806_v37 }
 0x4ef   : > { %1972 = vpow2.f32 %v807_v38 }
 0x4f9   : > { %v1973_v39 = vpop.eup %1972 }
 0x4fa   : > { %v809_v40 = vsel %vm551_vm2, %v1973_v39, 0.0 }
 0x4fb   : > { %810 = vadd.xlane.f32.xlu0 %v809_v40 }
 0x511   : > { %814 = vrot.lane.b32.xlu0 %v2223_v7, %s2060_s18  ;;  %s2063_s18 = smov 48  }
 0x515   : > { %988 = vrot.lane.b32.xlu0 %v2223_v7, %s2061_s21  ;;  %s2064_s21 = smov 72  }
 0x519   : > { %986 = vrot.lane.b32.xlu0 %v2223_v7, %s2062_s25  ;;  %s2065_s25 = smov 104  }
 0x588   : > { %v811_v43 = vpop.xlane.xlu0 %810 }
 0x589   : > { %1974 = vrcp.f32 %v811_v43 }
 0x58c   : > { %v815_v44 = vpop.permute.xlu0 %814 }
 0x58d   : > { %1840 = vmatpush3.msra.mxu0 %v815_v44 }
 0x58e   : > { %1850 = vmatprep.subr.bf16.mxu0 %v2054_v1 }
 0x590   : > { %v989_v53 = vpop.permute.xlu0 %988 }
 0x593   : > { %v1975_v46 = vpop.eup %1974 }
 0x594   : > { %v813_v47 = vmul.f32 %v1975_v46, %v1973_v39  ;;  %v987_v58 = vpop.permute.xlu0 %986 }
 0x596   : > { %1842 = vmatmul.mubr.msk.f32.vlgmr.msra.gmra.mrb[6].mxu0 %vm551_vm2, %v813_v47 }
 0x597   : > { %1851 = vmatpush3.bf16.msra.mxu0 %v944_v48  ;;  %1852 = vmatprep.mubr.msk.bf16.mxu0 %vm2055_vm0, %v2054_v1  ;;  %v1762_v48 = vld [vmem:[%s2428_s5] ss:$0 sm:$0xff] }
 0x598   : > { %1861 = vmatprep.subr.mxu0 %v2054_v1 }
 0x59a   : > { %1853 = vmatmul.mubr.msk.bf16.vlgmr.msra.gmra.mrb[8].mxu0 %vm551_vm2, %v721_v49 }
 0x59b   : > { %1863 = vmatprep.mubr.msk.f32.mxu0 %vm2055_vm0, %v2054_v1 }
 0x669   : > { %v886_v50 = vpop.f32.mrb[6].mxu0 }
 0x66a   : > { %v890_v51 = vpack.c.bf16 %v886_v50, %v886_v50  ;;  %v1843_v52 = vpop.f32.mrb[7].mxu0 }
 0x66c   : > { %1847 = vmatmul.mubr.msk.bf16.vlgmr.msra.gmra.mrb[4].mxu1 %vm551_vm2, %v890_v51 }
 0x66d   : > { %1857 = vmatpush3.xpose.msk.msra.mxu1 %vm551_vm2, %v989_v53  ;;  %v980_v54 = vpop.f32.mrb[8].mxu0  ;;  %1858 = vmatprep.mubr.msk.f32.mxu1 %vm2055_vm0, %v2054_v1 }
 0x66e   : > { %v1854_v55 = vpop.f32.mrb[9].mxu0  ;;  %1866 = vmatprep.subr.bf16.mxu1 %v2054_v1 }
 0x66f   : > { %v983_v56 = vpop.f32.mrb[10].mxu0 }
 0x670   : > { %v1855_v57 = vpop.f32.mrb[11].mxu0 }
 0x674   : > { %1859 = vmatmul.mubr.msk.f32.vlgmr.msra.gmra.mrb[8].mxu1 %vm551_vm2, %v987_v58 }
 0x675   : > { %1868 = vmatprep.mubr.msk.bf16.mxu1 %vm2055_vm0, %v2054_v1  ;;  %1867 = vmatpush3.bf16.msra.mxu1 %v1160_v21 }
 0x676   : > { %1882 = vmatprep.subr.bf16.mxu1 %v2054_v1 }
 0x73f   : > { %v934_v59 = vpop.f32.mrb[4].mxu1 }
 0x740   : > { %v2284_v60 = vadd.f32 %v980_v54, %v934_v59  ;;  %v1848_v61 = vpop.f32.mrb[5].mxu1 }
 0x741   : > { %v937_v62 = vpop.f32.mrb[6].mxu1  ;;  %v1962_v61 = vld [vmem:[%s2431_s8] sm:$0xff]  }
 0x742   : > { %v1849_v63 = vpop.f32.mrb[7].mxu1  ;;  %v1963_v62 = vld [vmem:[%s2431_s8 + $0x8] sm:$0xff]  }
 0x747   : > { %v1060_v0 = vpop.f32.mrb[8].mxu1 }
 0x748   : > { %v1064_v2 = vmul.f32 0.35355338, %v1060_v0  ;;  %v1860_v4 = vpop.f32.mrb[9].mxu1 }
 0x749   : > { %v1763_v4 = vld [vmem:[%s2429_s6] ss:$0 sm:$0xff] }
 0x74a   : > { %v1065_v5 = vadd.f32 %v2239_v14, %v1064_v2 }
 0x74c   : > { %v1066_v6 = vsel %vm551_vm2, %v1065_v5, -inf }
 0x74d   : > { %1067 = vmax.xlane.f32.xlu1 %v1066_v6  ;;  %v1764_v6 = vld [vmem:[%s2430_s7] ss:$0 sm:$0xff] }
 0x75e   : > { %1077 = vrot.lane.b32.xlu1 %v2223_v7, %s2063_s18  ;;  %s467_s18 = sand.u32 1, %s2044_s30  }
 0x762   : > { %1205 = vrot.lane.b32.xlu1 %v2223_v7, %s2064_s21  ;;  %s1736_s21 = sshll.u32 %s467_s18, 3 }
 0x763   : > { %s469_s20 = scalar_lea.vmem [#allocation2], %s1736_s21  ;;  %s1994_s21 = sshll.u32 %s2067_s17, 4  ;;  %s1995_s21 = int_to_ptr.vmem [resolvable:$false] %s1994_s21 }
 0x764   : > { %s1664_s1 = sshll.u32 %s469_s20, 4  ;;  %s1996_s27 = scalar_lea.vmem %s1995_s21, 256  ;;  %s2382_s1 = int_to_ptr.vmem [resolvable:$true] %s1664_s1 }
 0x765   : > { %s1990_s26 = scalar_lea.vmem %s2382_s1, 128  ;;  %p1997_p0 = scmp.lt.s32.totalorder %s2382_s1, %s1995_s21 }
 0x766   : > { %1203 = vrot.lane.b32.xlu1 %v2223_v7, %s2065_s25  ;;  %s1651_s25 = scalar_lea.sflag [#allocation3], %s467_s18  ;;  %p1991_p11 = scmp.ne.s32.totalorder %s2382_s1, %s1990_s26 }
 0x767   : > { %p1998_p1 = scmp.lt.s32.totalorder %s1996_s27, %s1990_s26 }
 0x768   : > { %p1992_p12 = pnand %p1991_p11, %p2181_p5 }
 0x769   : > { %p1999_p2 = por %p1998_p1, %p1997_p0 }
 0x76a   : > { %p1993_p13 = pneg %p1992_p12 }
 0x76c   : > { %p2000_p3 = pnand %p1999_p2, %p1993_p13 }
 0x7da   : > { %v1068_v8 = vpop.xlane.xlu1 %1067 }
 0x7db   : > { %v1069_v9 = vsub.f32 %v1065_v5, %v1068_v8 }
 0x7dd   : > { %v1070_v10 = vmul.f32 1.442695, %v1069_v9 }
 0x7de   : > { %v1078_v11 = vpop.permute.xlu1 %1077 }
 0x7df   : > { %1976 = vpow2.f32 %v1070_v10  ;;  %1862 = vmatpush3.msra.mxu0 %v1078_v11  ;;  %v1964_v11 = vld [vmem:[%s2433_s10] sm:$0xff]  }
 0x7e0   : > { %1872 = vmatprep.subr.mxu0 %v2054_v1 }
 0x7e2   : > { %v1206_v17 = vpop.permute.xlu1 %1205 }
 0x7e6   : > { %v1204_v19 = vpop.permute.xlu1 %1203 }
 0x7e9   : > { %v1977_v12 = vpop.eup %1976 }
 0x7ea   : > { %v1072_v13 = vsel %vm551_vm2, %v1977_v12, 0.0 }
 0x7eb   : > { %1073 = vadd.xlane.f32.xlu0 %v1072_v13  ;;  %v1966_v13 = vld [vmem:[%s2433_s10 + $0x10] sm:$0xff]  }
 0x878   : > { %v1074_v15 = vpop.xlane.xlu0 %1073 }
 0x879   : > { %1978 = vrcp.f32 %v1074_v15  ;;  %v1967_v15 = vld [vmem:[%s2433_s10 + $0x18] sm:$0xff]  }
 0x883   : > { %v1979_v16 = vpop.eup %1978 }
 0x884   : > { %v1076_v18 = vmul.f32 %v1979_v16, %v1977_v12  ;;  %v1965_v12 = vld [vmem:[%s2433_s10 + $0x8] sm:$0xff]   ;;  %v1765_v16 = vld [vmem:[%s2432_s9] ss:$0 sm:$0xff] }
 0x886   : > { %1864 = vmatmul.mubr.msk.f32.vlgmr.msra.gmra.mrb[12].mxu0 %vm551_vm2, %v1076_v18 }
 0x887   : > { %1873 = vmatpush3.xpose.msk.msra.mxu0 %vm551_vm2, %v1206_v17  ;;  %1874 = vmatprep.mubr.msk.f32.mxu0 %vm2055_vm0, %v2054_v1 }
 0x888   : > { %1877 = vmatprep.subr.mxu0 %v2054_v1 }
 0x88a   : > { %1875 = vmatmul.mubr.msk.f32.vlgmr.msra.gmra.mrb[14].mxu0 %vm551_vm2, %v1204_v19 }
 0x88b   : > { %1879 = vmatprep.mubr.msk.f32.mxu0 %vm2055_vm0, %v2054_v1 }
 0x959   : > { %v1149_v22 = vpop.f32.mrb[12].mxu0 }
 0x95a   : > { %v1153_v23 = vpack.c.bf16 %v1149_v22, %v1149_v22  ;;  %v1865_v24 = vpop.f32.mrb[13].mxu0 }
 0x95c   : > { %1869 = vmatmul.mubr.msk.bf16.vlgmr.msra.gmra.mrb[12].mxu1 %vm551_vm2, %v1153_v23 }
 0x95d   : > { %v1277_v25 = vpop.f32.mrb[14].mxu0  ;;  %1884 = vmatprep.mubr.msk.bf16.mxu1 %vm2055_vm0, %v2054_v1 }
 0x95e   : > { %v1281_v26 = vmul.f32 0.35355338, %v1277_v25  ;;  %v1876_v27 = vpop.f32.mrb[15].mxu0 }
 0x960   : > { %v1282_v28 = vadd.f32 %v2239_v14, %v1281_v26 }
 0x962   : > { %v1283_v29 = vsel %vm551_vm2, %v1282_v28, -inf }
 0x963   : > { %1284 = vmax.xlane.f32.xlu1 %v1283_v29 }
 0x9f0   : > { %v1285_v30 = vpop.xlane.xlu1 %1284 }
 0x9f1   : > { %v1286_v31 = vsub.f32 %v1282_v28, %v1285_v30 }
 0x9f3   : > { %v1287_v32 = vmul.f32 1.442695, %v1286_v31  ;;  %v1769_v31 = vld [vmem:[%s2434_s11] ss:$0 sm:$0xff] }
 0x9f5   : > { %1980 = vpow2.f32 %v1287_v32 }
 0x9ff   : > { %v1981_v33 = vpop.eup %1980 }
 0xa00   : > { %v1289_v34 = vsel %vm551_vm2, %v1981_v33, 0.0 }
 0xa01   : > { %1290 = vadd.xlane.f32.xlu0 %v1289_v34 }
 0xa17   : > { %1294 = vrot.lane.b32.xlu0 %v2223_v7, %s2066_s28  ;;  %v1760_v7 = vld [vmem:[%s2449_s4 + $0xc] sm:$0xf]  ;;  %s2380_s4 = scalar_lea.hbm %s2437_s14, %s1778_s0 }
 0xa18   : > { %v1377_v43 = vsel %vm896_vm3, %v1760_v7, 0 }
 0xa19   : > { %1883 = vmatpush3.bf16.msra.mxu1 %v1377_v43 }
 0xa1a   : > { %1896 = vmatprep.subr.bf16.mxu1 %v2054_v1 }
 0xa2f   : > { %v1196_v35 = vpop.f32.mrb[12].mxu1 }
 0xa30   : > { %v1202_v36 = vadd.f32 %v1196_v35, %v2284_v60  ;;  %v1870_v37 = vpop.f32.mrb[13].mxu1 }
 0xa31   : > { %v1199_v38 = vpop.f32.mrb[14].mxu1 }
 0xa32   : > { %v1871_v14 = vpop.f32.mrb[15].mxu1 }
 0xa8e   : > { %v1291_v39 = vpop.xlane.xlu0 %1290 }
 0xa8f   : > { %1982 = vrcp.f32 %v1291_v39 }
 0xa92   : > { %v1295_v40 = vpop.permute.xlu0 %1294 }
 0xa93   : > { %1878 = vmatpush3.msra.mxu0 %v1295_v40 }
 0xa94   : > { %1888 = vmatprep.subr.bf16.mxu0 %v2054_v1 }
 0xa99   : > { %v1983_v41 = vpop.eup %1982 }
 0xa9a   : > { %v1293_v42 = vmul.f32 %v1983_v41, %v1981_v33 }
 0xa9c   : > { %1880 = vmatmul.mubr.msk.f32.vlgmr.msra.gmra.mrb[16].mxu0 %vm551_vm2, %v1293_v42 }
 0xa9d   : > { %1892 = vmatprep.mubr.msk.bf16.mxu0 %vm2055_vm0, %v2054_v1  ;;  %1889 = vmatpush3.bf16.msra.mxu0 %v1962_v61 }
 0xa9e   : > { %1890 = vmatprep.subr.bf16.mxu0 %v2054_v1 }
 0xaa1   : > { %1891 = vmatpush3.bf16.msra.mxu0 %v1963_v62 }
 0xb6f   : > { %v1366_v44 = vpop.f32.mrb[16].mxu0 }
 0xb70   : > { %v1370_v45 = vpack.c.bf16 %v1366_v44, %v1366_v44  ;;  %v1881_v46 = vpop.f32.mrb[17].mxu0 }
 0xb71   : > { %v1775_v46 = vld [vmem:[%s2435_s12] ss:$0 sm:$0xff] }
 0xb72   : > { %1885 = vmatmul.mubr.msk.bf16.vlgmr.msra.gmra.mrb[16].mxu1 %vm551_vm2, %v1370_v45 }
 0xb73   : > { %1904 = vmatprep.mubr.msk.bf16.mxu1 %vm2055_vm0, %v2054_v1  ;;  %1897 = vmatpush3.bf16.msra.mxu1 %v1964_v11 }
 0xb74   : > { %1898 = vmatprep.subr.bf16.mxu1 %v2054_v1 }
 0xb77   : > { %1899 = vmatpush3.bf16.msra.mxu1 %v1965_v12 }
 0xb78   : > { %1900 = vmatprep.subr.bf16.mxu1 %v2054_v1 }
 0xb7b   : > { %1901 = vmatpush3.bf16.msra.mxu1 %v1966_v13 }
 0xb7c   : > { %1902 = vmatprep.subr.bf16.mxu1 %v2054_v1 }
 0xb7f   : > { %1903 = vmatpush3.bf16.msra.mxu1 %v1967_v15 }
 0xc45   : > { %v1413_v47 = vpop.f32.mrb[16].mxu1 }
 0xc46   : > { %v1419_v49 = vadd.f32 %v1413_v47, %v1202_v36  ;;  %v1886_v50 = vpop.f32.mrb[17].mxu1 }
 0xc47   : > { %v1416_v51 = vpop.f32.mrb[18].mxu1 }
 0xc48   : > { %v1427_v52 = vadd.f32 %v1762_v48, %v1419_v49  ;;  %v1887_v53 = vpop.f32.mrb[19].mxu1  ;;  %v1776_v48 = vld [vmem:[%s2436_s13] ss:$0 sm:$0xff] }
 0xc4a   : > { %v1428_v54 = vadd.f32 %v1427_v52, %v2213_v3 }
 0xc4c   : > { %v1431_v55 = vsel %vm504_vm1, %v1428_v54, 0.0 }
 0xc4d   : > { %1432 = vadd.xlane.f32.xlu0 %v1431_v55 }
 0xcda   : > { %v1433_v56 = vpop.xlane.xlu0 %1432 }
 0xcdb   : > { %v1435_v57 = vmul.f32 0.03125, %v1433_v56 }
 0xcdd   : > { %v1436_v58 = vsub.f32 %v1428_v54, %v1435_v57 }
 0xcdf   : > { %v1437_v59 = vmul.f32 %v1436_v58, %v1436_v58 }
 0xce1   : > { %v1438_v60 = vsel %vm504_vm1, %v1437_v59, 0.0 }
 0xce2   : > { %1439 = vadd.xlane.f32.xlu1 %v1438_v60 }
 0xd6f   : > { %v1440_v3 = vpop.xlane.xlu1 %1439 }
 0xd70   : > { %v1441_v63 = vmul.f32 0.03125, %v1440_v3 }
 0xd72   : > { %v1442_v0 = vadd.f32 1e-05, %v1441_v63 }
 0xd74   : > { %1984 = vrsqrt.f32 %v1442_v0 }
 0xd7e   : > { %v1985_v2 = vpop.eup %1984 }
 0xd7f   : > { %v1444_v5 = vmul.f32 %v1985_v2, %v1436_v58 }
 0xd81   : > { %v1451_v8 = vmul.f32 %v1763_v4, %v1444_v5 }
 0xd83   : > { %v1458_v9 = vadd.f32 %v1764_v6, %v1451_v8 }
 0xd85   : > { %v1459_v10 = vpack.c.bf16 %v1458_v9, %v1458_v9 }
 0xd87   : > { %1893 = vmatmul.mubr.msk.bf16.vlgmr.msra.gmra.mrb[20].mxu0 %vm504_vm1, %v1459_v10 }
 0xe5a   : > { %v1520_v17 = vpop.f32.mrb[20].mxu0 }
 0xe5b   : > { %v1521_v18 = vadd.f32 %v1765_v16, %v1520_v17  ;;  %v1894_v19 = vpop.f32.mrb[21].mxu0 }
 0xe5c   : > { %v1523_v20 = vpop.f32.mrb[22].mxu0 }
 0xe5d   : > { %v1526_v21 = vmul.f32 %v1521_v18, %v1521_v18  ;;  %v1895_v22 = vpop.f32.mrb[23].mxu0 }
 0xe5f   : > { %v1527_v23 = vmul.f32 %v1526_v21, %v1521_v18 }
 0xe61   : > { %v1528_v24 = vmul.f32 0.044715, %v1527_v23 }
 0xe63   : > { %v1529_v25 = vadd.f32 %v1528_v24, %v1521_v18 }
 0xe65   : > { %v1530_v26 = vmul.f32 0.7978846, %v1529_v25 }
 0xe67   : > { %1986 = vtanh.f32 %v1530_v26 }
 0xe71   : > { %v1987_v1 = vpop.eup %1986 }
 0xe72   : > { %v1532_v27 = vadd.f32 1.0, %v1987_v1 }
 0xe74   : > { %v1533_v28 = vmul.f32 0.5, %v1532_v27 }
 0xe76   : > { %v1534_v29 = vmul.f32 %v1533_v28, %v1521_v18 }
 0xe78   : > { %v1535_v30 = vpack.c.bf16 %v1534_v29, %v1534_v29 }
 0xe7a   : > { %1905 = vmatmul.mubr.msk.bf16.vlgmr.msra.gmra.mrb[20].mxu1 %vm1575_vm4, %v1535_v30 }
 0xf4d   : > { %v1613_v32 = vpop.f32.mrb[20].mxu1 }
 0xf4e   : > { %v1614_v33 = vadd.f32 %v1769_v31, %v1613_v32  ;;  %v1906_v34 = vpop.f32.mrb[21].mxu1 }
 0xf4f   : > { %v1616_v35 = vpop.f32.mrb[22].mxu1 }
 0xf50   : > { %v1907_v36 = vpop.f32.mrb[23].mxu1  ;;  %v1619_v37 = vadd.f32 %v1614_v33, %v1458_v9 }
 0xf52   : > { %v1622_v38 = vsel %vm504_vm1, %v1619_v37, 0.0 }
 0xf53   : > { %1623 = vadd.xlane.f32.xlu1 %v1622_v38 }
 0xfe0   : > { %v1624_v14 = vpop.xlane.xlu1 %1623 }
 0xfe1   : > { %v1625_v39 = vmul.f32 0.03125, %v1624_v14 }
 0xfe3   : > { %v1626_v40 = vsub.f32 %v1619_v37, %v1625_v39 }
 0xfe5   : > { %v1627_v41 = vmul.f32 %v1626_v40, %v1626_v40 }
 0xfe7   : > { %v1628_v42 = vsel %vm504_vm1, %v1627_v41, 0.0 }
 0xfe8   : > { %1629 = vadd.xlane.f32.xlu1 %v1628_v42 }
0x1075   : > { %v1630_v7 = vpop.xlane.xlu1 %1629 }
0x1076   : > { %v1631_v43 = vmul.f32 0.03125, %v1630_v7 }
0x1078   : > { %v1632_v44 = vadd.f32 1e-05, %v1631_v43 }
0x107a   : > { %1988 = vrsqrt.f32 %v1632_v44 }
0x1084   : > { %v1989_v45 = vpop.eup %1988 }
0x1085   : > { %v1634_v47 = vmul.f32 %v1989_v45, %v1626_v40 }
0x1087   : > { %v1641_v49 = vmul.f32 %v1775_v46, %v1634_v47 }
0x1089   : > { %v1648_v50 = vadd.f32 %v1776_v48, %v1641_v49 }
0x108b   : > { %1649 = vst.msk [vmem:[%s469_s20] sm:$0xff] %vm504_vm1, %v1648_v50 }
0x108c   : > { %2003 = shalt.err (!%p2000_p3)
}
0x108d   : > { %s2004_s2 = scalar_lea.hbm %s2380_s4, 128  ;;  %s2008_s28 = scalar_lea.hbm %s2437_s14, 256 }
0x108e   : > { %p2005_p4 = scmp.ne.s32.totalorder %s2380_s4, %s2004_s2  ;;  %p2009_p9 = scmp.lt.u32.totalorder %s2380_s4, %s2437_s14 }
0x108f   : > { %p2010_p10 = scmp.lt.u32.totalorder %s2008_s28, %s2004_s2  ;;  %p2012_p12 = scmp.lt.u32.totalorder %s2004_s2, %s2380_s4 }
0x1090   : > { %p2006_p7 = pnand %p2005_p4, %p2181_p5 }
0x1091   : > { %p2011_p11 = por %p2010_p10, %p2009_p9 }
0x1092   : > { %p2007_p8 = pneg %p2006_p7 }
0x1093   : > { %p2013_p13 = por %p2012_p12, %p2011_p11 }
0x1095   : > { %p2014_p0 = pnand %p2013_p13, %p2007_p8 }
0x1097   : > { %2017 = shalt.err (!%p2014_p0)
}
0x1098   : > { %1908 = dma.vmem_to_hbm [thread:$0]  (%p2181_p5), %s2382_s1, 128, %s2380_s4, %s1651_s25  }
0x1099 PF: > { %p1914_p1 = scmp.ge.s32.totalorder %s2052_s16, 2  ;;  %s1676_s26 = sand.u32 1, %s2040_s29  }
0x109a   : > { %s1677_s17 = scalar_lea.sflag [#allocation3], %s1676_s26 }
0x109b   : > { %p1911_p2 = pnand %p1914_p1, %p2185_p6 }
0x109d   : > { %2035 = dma.done.wait (!%p1911_p2), %s1677_s17, 128  }
0x109e   : > { %2037 = vsyncadd (!%p1911_p2), %s1677_s17, 4294967168  ;;  %p24_p3 = scmp.ge.s32.totalorder %s2168_s19, 4   ;;  %s2450_s29 = smov %s2044_s30 }
0x109f   : > { %s2451_s30 = smov %s2048_s15  ;;  %s2452_s15 = smov %s2179_s22 }
0x10a0   : > { %s2453_s16 = smov %s2168_s19  ;;  %26 = sbr.rel (!%p24_p3) target bundleno = 9 (0x9), region = 117 }
0x10a7   :  { %1682 = vsyncpa [#allocation3], 1 }
0x10a8   :  { %1684 = vsyncpa [#allocation3 + $0x1], 1 }

</bundles_post_ra>
